<compile_context>
chip_gen: v7x
topology: tpu7x:2x2x1
jax: 0.10.0
libtpu: 0.0.40
codegen_flags: <defaults>
</compile_context>

<pallas_src>
import functools
import math

import jax
import jax.numpy as jnp
from jax import lax
from jax.experimental import pallas as pl
from jax.experimental.pallas import tpu as pltpu

PAD = 0
LN_EPS = 1e-6


# ----------------------------- Pallas kernel --------------------------------
def _layer_norm(x, gamma, beta, eps=LN_EPS):
    mean = jnp.mean(x, axis=-1, keepdims=True)
    var = jnp.mean((x - mean) ** 2, axis=-1, keepdims=True)
    return (x - mean) * lax.rsqrt(var + eps) * gamma + beta


def encoder_layer_kernel(x_ref, tem_ref, npm_ref, npm_k_ref,
                         wq_ref, wk_ref, wv_ref, wo_ref, bo_ref,
                         ln1_g_ref, ln1_b_ref,
                         w1_ref, b1_ref, w2_ref, b2_ref,
                         ln2_g_ref, ln2_b_ref,
                         out_ref,
                         *, n_head, d_k, d_v):
    Bt, L, D = x_ref.shape
    H = n_head
    rows = Bt * L

    # Fused `enc_output += tem_enc` (saves one (B, L, D) HBM round trip/layer).
    x3 = x_ref[...] + tem_ref[...]                      # (Bt, L, D) f32
    npm2 = npm_ref[...].reshape(rows, 1)                # (rows, 1)  f32
    x2 = x3.reshape(rows, D)                            # (rows, D)  f32

    # ------- Multi-head self attention (normalize_before=False -> post-LN) --
    residual = x2
    xb = x2.astype(jnp.bfloat16)
    # wq is pre-scaled by 1/sqrt(d_k) on the host.
    q = jnp.dot(xb, wq_ref[...], preferred_element_type=jnp.float32)  # (rows, H*dk)
    k = jnp.dot(xb, wk_ref[...], preferred_element_type=jnp.float32)
    v = jnp.dot(xb, wv_ref[...], preferred_element_type=jnp.float32)

    def split_heads(t, dh):
        # (rows, H*dh) -> (H*Bt, L, dh); batch index = h*Bt + b
        t3 = t.astype(jnp.bfloat16).reshape(Bt, L, H * dh)
        return jnp.concatenate(
            [t3[:, :, h * dh:(h + 1) * dh] for h in range(H)], axis=0)

    qh = split_heads(q, d_k)                            # (H*Bt, L, d_k) bf16
    kh = split_heads(k, d_k)
    vh = split_heads(v, d_v)

    # Batched over (head, batch): two batched dots instead of per-head dots.
    scores = jnp.einsum('bqd,bkd->bqk', qh, kh,
                        preferred_element_type=jnp.float32)   # (H*Bt, L, L)

    # Mask built in-kernel: causal (strict upper triangle) | key-padding.
    row_i = lax.broadcasted_iota(jnp.int32, (L, L), 0)
    col_i = lax.broadcasted_iota(jnp.int32, (L, L), 1)
    causal = col_i > row_i                              # (L, L)   bool
    key_pad = npm_k_ref[...] == 0.0                     # (Bt, 1, L) bool
    mask_b = jnp.logical_or(causal[None, :, :], key_pad)        # (Bt, L, L)
    mask = jnp.broadcast_to(mask_b[None], (H, Bt, L, L)).reshape(H * Bt, L, L)
    scores = jnp.where(mask, -1e9, scores)

    # Softmax in f32; divide moved to the EUP via approximate reciprocal.
    scores = scores - jnp.max(scores, axis=-1, keepdims=True)
    p = jnp.exp(scores)
    p = p * pl.reciprocal(jnp.sum(p, axis=-1, keepdims=True), approx=True)

    ctx = jnp.einsum('bqk,bkd->bqd', p.astype(jnp.bfloat16), vh,
                     preferred_element_type=jnp.float32)       # (H*Bt, L, d_v)
    merged = jnp.concatenate(
        [ctx[h * Bt:(h + 1) * Bt] for h in range(H)], axis=-1)  # (Bt, L, H*dv)
    merged = merged.reshape(rows, H * d_v)

    attn_out = jnp.dot(merged.astype(jnp.bfloat16), wo_ref[...],
                       preferred_element_type=jnp.float32) + bo_ref[...]
    attn_out = attn_out + residual
    attn_out = _layer_norm(attn_out, ln1_g_ref[...], ln1_b_ref[...])
    attn_out = attn_out * npm2                                  # non_pad_mask

    # ------------------------- Position-wise FFN ----------------------------
    residual2 = attn_out
    h1 = jnp.dot(attn_out.astype(jnp.bfloat16), w1_ref[...],
                 preferred_element_type=jnp.float32) + b1_ref[...]
    # TODO(synk): tanh-approximate GELU (PyTorch F.gelu uses the exact erf form)
    h1 = 0.5 * h1 * (1.0 + jnp.tanh(0.7978845608028654 *
                                    (h1 + 0.044715 * h1 * h1 * h1)))
    h2 = jnp.dot(h1.astype(jnp.bfloat16), w2_ref[...],
                 preferred_element_type=jnp.float32) + b2_ref[...]
    ffn_out = _layer_norm(h2 + residual2, ln2_g_ref[...], ln2_b_ref[...])
    out_ref[...] = (ffn_out * npm2).reshape(Bt, L, D)


def _pick_batch_tile(B, L, target_rows=512):
    """Largest divisor of B whose (Bt*L, D) block stays near target_rows rows."""
    bt = 1
    for cand in range(1, B + 1):
        if B % cand == 0 and cand * L <= max(target_rows, L):
            bt = cand
    return bt


def encoder_layer(x, tem_enc, non_pad_mask, non_pad_mask_keys, lp,
                  *, n_head, d_k, d_v):
    """One EncoderLayer forward via pallas_call, grid over batch tiles."""
    B, L, D = x.shape
    Bt = _pick_batch_tile(B, L)

    # bf16 matmul weights (bf16 MXU path + half the weight DMA traffic);
    # biases / LayerNorm params stay f32. 1/sqrt(d_k) folded into wq.
    inv_temp = 1.0 / math.sqrt(d_k)
    weights = [
        (lp["wq"] * inv_temp).astype(jnp.bfloat16),
        lp["wk"].astype(jnp.bfloat16),
        lp["wv"].astype(jnp.bfloat16),
        lp["wo"].astype(jnp.bfloat16),
        lp["bo"], lp["ln1_g"], lp["ln1_b"],
        lp["w1"].astype(jnp.bfloat16), lp["b1"],
        lp["w2"].astype(jnp.bfloat16), lp["b2"],
        lp["ln2_g"], lp["ln2_b"],
    ]

    def full_spec(a):
        nd = a.ndim
        return pl.BlockSpec(a.shape, lambda b, _nd=nd: (0,) * _nd)

    kernel = functools.partial(encoder_layer_kernel,
                               n_head=n_head, d_k=d_k, d_v=d_v)
    return pl.pallas_call(
        kernel,
        out_shape=jax.ShapeDtypeStruct((B, L, D), jnp.float32),
        grid=(B // Bt,),
        in_specs=[
            pl.BlockSpec((Bt, L, D), lambda b: (b, 0, 0)),   # enc_output
            pl.BlockSpec((Bt, L, D), lambda b: (b, 0, 0)),   # temporal encoding
            pl.BlockSpec((Bt, L, 1), lambda b: (b, 0, 0)),   # non_pad_mask (rows)
            pl.BlockSpec((Bt, 1, L), lambda b: (b, 0, 0)),   # non_pad_mask (keys)
        ] + [full_spec(w) for w in weights],
        out_specs=pl.BlockSpec((Bt, L, D), lambda b: (b, 0, 0)),
        compiler_params=pltpu.CompilerParams(
            dimension_semantics=("parallel",)),
    )(x, tem_enc, non_pad_mask, non_pad_mask_keys, *weights)


# ------------------------------ JAX glue -------------------------------------
def temporal_enc(event_time, non_pad_mask, position_vec):
    """(B, L) -> (B, L, d_model): sin on even dims, cos on odd dims."""
    tt = event_time[..., None] / position_vec            # (B, L, D)
    idx = jnp.arange(position_vec.shape[0])
    even = (idx % 2) == 0
    result = jnp.where(even, jnp.sin(tt), jnp.cos(tt))
    return result * non_pad_mask


def encoder_forward(params, event_type, event_time, non_pad_mask,
                    *, n_head, d_k, d_v):
    # The O(L^2) attention mask is built inside the kernel from O(L) data.
    non_pad_mask = non_pad_mask.astype(jnp.float32)
    npm_keys = jnp.transpose(non_pad_mask, (0, 2, 1))     # (B, 1, L)
    tem_enc = temporal_enc(event_time, non_pad_mask, params["position_vec"])
    enc_output = params["event_emb"][event_type]          # embedding lookup
    for lp in params["layers"]:
        # `enc_output += tem_enc` is fused into the layer kernel.
        enc_output = encoder_layer(enc_output, tem_enc, non_pad_mask, npm_keys,
                                   lp, n_head=n_head, d_k=d_k, d_v=d_v)
    return enc_output


# --------------------------- deterministic init -------------------------------
def init_params(key, num_types, d_model, d_inner, n_layers, n_head, d_k, d_v):
    position_vec = jnp.array(
        [math.pow(10000.0, 2.0 * (i // 2) / d_model) for i in range(d_model)],
        dtype=jnp.float32)

    key, ek = jax.random.split(key)
    emb = 0.1 * jax.random.normal(ek, (num_types + 1, d_model), jnp.float32)
    emb = emb.at[PAD].set(0.0)                            # padding_idx = PAD

    layers = []
    for _ in range(n_layers):
        key, *ks = jax.random.split(key, 8)
        s = 0.1
        layers.append(dict(
            wq=s * jax.random.normal(ks[0], (d_model, n_head * d_k), jnp.float32),
            wk=s * jax.random.normal(ks[1], (d_model, n_head * d_k), jnp.float32),
            wv=s * jax.random.normal(ks[2], (d_model, n_head * d_v), jnp.float32),
            wo=s * jax.random.normal(ks[3], (n_head * d_v, d_model), jnp.float32),
            bo=jnp.zeros((1, d_model), jnp.float32),
            ln1_g=jnp.ones((1, d_model), jnp.float32),
            ln1_b=jnp.zeros((1, d_model), jnp.float32),
            w1=s * jax.random.normal(ks[4], (d_model, d_inner), jnp.float32),
            b1=0.01 * jax.random.normal(ks[5], (1, d_inner), jnp.float32),
            w2=s * jax.random.normal(ks[6], (d_inner, d_model), jnp.float32),
            b2=jnp.zeros((1, d_model), jnp.float32),
            ln2_g=jnp.ones((1, d_model), jnp.float32),
            ln2_b=jnp.zeros((1, d_model), jnp.float32),
        ))
    return dict(position_vec=position_vec, event_emb=emb, layers=layers)


# --------------------------------- main ---------------------------------------
if __name__ == "__main__":
    # small THP-encoder config
    num_types, d_model, d_inner = 5, 32, 64
    n_layers, n_head, d_k, d_v = 2, 4, 8, 8
    B, L = 2, 8

    key = jax.random.PRNGKey(0)
    key, k1, k2 = jax.random.split(key, 3)

    params = init_params(key, num_types, d_model, d_inner,
                         n_layers, n_head, d_k, d_v)

    # event types in [0, num_types]; force a couple of PAD (=0) positions
    event_type = jax.random.randint(k1, (B, L), 1, num_types + 1, jnp.int32)
    event_type = event_type.at[:, -2:].set(PAD)
    event_time = jnp.cumsum(
        jax.random.uniform(k2, (B, L), jnp.float32, 0.1, 1.0), axis=1)
    event_time = event_time * (event_type != PAD)
    non_pad_mask = (event_type != PAD).astype(jnp.float32)[..., None]  # (B,L,1)

    fwd = jax.jit(functools.partial(encoder_forward,
                                    n_head=n_head, d_k=d_k, d_v=d_v))
    out = fwd(params, event_type, event_time, non_pad_mask)
    out = jax.block_until_ready(out)
    assert out.shape == (B, L, d_model)
    assert bool(jnp.all(jnp.isfinite(out)))
    print("KERNEL_OK")
</pallas_src>

<mosaic_0001>
module attributes {stable_mosaic.version = 11 : i64} {
  func.func @encoder_layer_kernel(%arg0: i32, %arg1: memref<2x8x32xf32, #tpu.memory_space<vmem>>, %arg2: memref<2x8x32xf32, #tpu.memory_space<vmem>>, %arg3: memref<2x8x1xf32, #tpu.memory_space<vmem>>, %arg4: memref<2x1x8xf32, #tpu.memory_space<vmem>>, %arg5: memref<32x32xbf16, #tpu.memory_space<vmem>>, %arg6: memref<32x32xbf16, #tpu.memory_space<vmem>>, %arg7: memref<32x32xbf16, #tpu.memory_space<vmem>>, %arg8: memref<32x32xbf16, #tpu.memory_space<vmem>>, %arg9: memref<1x32xf32, #tpu.memory_space<vmem>>, %arg10: memref<1x32xf32, #tpu.memory_space<vmem>>, %arg11: memref<1x32xf32, #tpu.memory_space<vmem>>, %arg12: memref<32x64xbf16, #tpu.memory_space<vmem>>, %arg13: memref<1x64xf32, #tpu.memory_space<vmem>>, %arg14: memref<64x32xbf16, #tpu.memory_space<vmem>>, %arg15: memref<1x32xf32, #tpu.memory_space<vmem>>, %arg16: memref<1x32xf32, #tpu.memory_space<vmem>>, %arg17: memref<1x32xf32, #tpu.memory_space<vmem>>, %arg18: memref<2x8x32xf32, #tpu.memory_space<vmem>>) attributes {dimension_semantics = [#tpu.dimension_semantics<parallel>], iteration_bounds = array<i64: 1>, scalar_prefetch = 0 : i64, scratch_operands = 0 : i64, tpu.core_type = #tpu.core_type<tc>, window_params = [{transform_indices = @transform_0, window_bounds = array<i64: 2, 8, 32>}, {transform_indices = @transform_1, window_bounds = array<i64: 2, 8, 32>}, {transform_indices = @transform_2, window_bounds = array<i64: 2, 8, 1>}, {transform_indices = @transform_3, window_bounds = array<i64: 2, 1, 8>}, {pipeline_mode = #tpu.pipeline_mode<synchronous>, transform_indices = @transform_4, window_bounds = array<i64: 32, 32>}, {pipeline_mode = #tpu.pipeline_mode<synchronous>, transform_indices = @transform_5, window_bounds = array<i64: 32, 32>}, {pipeline_mode = #tpu.pipeline_mode<synchronous>, transform_indices = @transform_6, window_bounds = array<i64: 32, 32>}, {pipeline_mode = #tpu.pipeline_mode<synchronous>, transform_indices = @transform_7, window_bounds = array<i64: 32, 32>}, {pipeline_mode = #tpu.pipeline_mode<synchronous>, transform_indices = @transform_8, window_bounds = array<i64: 1, 32>}, {pipeline_mode = #tpu.pipeline_mode<synchronous>, transform_indices = @transform_9, window_bounds = array<i64: 1, 32>}, {pipeline_mode = #tpu.pipeline_mode<synchronous>, transform_indices = @transform_10, window_bounds = array<i64: 1, 32>}, {pipeline_mode = #tpu.pipeline_mode<synchronous>, transform_indices = @transform_11, window_bounds = array<i64: 32, 64>}, {pipeline_mode = #tpu.pipeline_mode<synchronous>, transform_indices = @transform_12, window_bounds = array<i64: 1, 64>}, {pipeline_mode = #tpu.pipeline_mode<synchronous>, transform_indices = @transform_13, window_bounds = array<i64: 64, 32>}, {pipeline_mode = #tpu.pipeline_mode<synchronous>, transform_indices = @transform_14, window_bounds = array<i64: 1, 32>}, {pipeline_mode = #tpu.pipeline_mode<synchronous>, transform_indices = @transform_15, window_bounds = array<i64: 1, 32>}, {pipeline_mode = #tpu.pipeline_mode<synchronous>, transform_indices = @transform_16, window_bounds = array<i64: 1, 32>}, {transform_indices = @transform_17, window_bounds = array<i64: 2, 8, 32>}]} {
    %c0 = arith.constant 0 : index
    %c0_0 = arith.constant 0 : index
    %c0_1 = arith.constant 0 : index
    %0 = vector.load %arg1[%c0, %c0_0, %c0_1] : memref<2x8x32xf32, #tpu.memory_space<vmem>>, vector<2x8x32xf32>
    %c0_2 = arith.constant 0 : index
    %c0_3 = arith.constant 0 : index
    %c0_4 = arith.constant 0 : index
    %1 = vector.load %arg2[%c0_2, %c0_3, %c0_4] : memref<2x8x32xf32, #tpu.memory_space<vmem>>, vector<2x8x32xf32>
    %2 = arith.addf %0, %1 : vector<2x8x32xf32>
    %c0_5 = arith.constant 0 : index
    %c0_6 = arith.constant 0 : index
    %c0_7 = arith.constant 0 : index
    %3 = vector.load %arg3[%c0_5, %c0_6, %c0_7] : memref<2x8x1xf32, #tpu.memory_space<vmem>>, vector<2x8x1xf32>
    %4 = vector.shape_cast %3 : vector<2x8x1xf32> to vector<16x1xf32>
    %5 = vector.shape_cast %2 : vector<2x8x32xf32> to vector<16x32xf32>
    %6 = arith.truncf %5 : vector<16x32xf32> to vector<16x32xbf16>
    %c0_8 = arith.constant 0 : index
    %c0_9 = arith.constant 0 : index
    %7 = vector.load %arg5[%c0_8, %c0_9] : memref<32x32xbf16, #tpu.memory_space<vmem>>, vector<32x32xbf16>
    %cst = arith.constant dense<0.000000e+00> : vector<16x32xf32>
    %8 = tpu.matmul %6, %7, %cst {dimension_numbers = #tpu.dot_dimension_numbers<[1], [0], [0], [1], [0, 0, 1, 1], [], []>} : vector<16x32xbf16>, vector<32x32xbf16>, vector<16x32xf32> -> vector<16x32xf32>
    %c0_10 = arith.constant 0 : index
    %c0_11 = arith.constant 0 : index
    %9 = vector.load %arg6[%c0_10, %c0_11] : memref<32x32xbf16, #tpu.memory_space<vmem>>, vector<32x32xbf16>
    %cst_12 = arith.constant dense<0.000000e+00> : vector<16x32xf32>
    %10 = tpu.matmul %6, %9, %cst_12 {dimension_numbers = #tpu.dot_dimension_numbers<[1], [0], [0], [1], [0, 0, 1, 1], [], []>} : vector<16x32xbf16>, vector<32x32xbf16>, vector<16x32xf32> -> vector<16x32xf32>
    %c0_13 = arith.constant 0 : index
    %c0_14 = arith.constant 0 : index
    %11 = vector.load %arg7[%c0_13, %c0_14] : memref<32x32xbf16, #tpu.memory_space<vmem>>, vector<32x32xbf16>
    %cst_15 = arith.constant dense<0.000000e+00> : vector<16x32xf32>
    %12 = tpu.matmul %6, %11, %cst_15 {dimension_numbers = #tpu.dot_dimension_numbers<[1], [0], [0], [1], [0, 0, 1, 1], [], []>} : vector<16x32xbf16>, vector<32x32xbf16>, vector<16x32xf32> -> vector<16x32xf32>
    %13 = arith.truncf %8 : vector<16x32xf32> to vector<16x32xbf16>
    %14 = vector.shape_cast %13 : vector<16x32xbf16> to vector<2x8x32xbf16>
    %15 = vector.extract_strided_slice %14 {offsets = [0, 0, 0], sizes = [2, 8, 8], strides = [1, 1, 1]} : vector<2x8x32xbf16> to vector<2x8x8xbf16>
    %16 = vector.extract_strided_slice %14 {offsets = [0, 0, 8], sizes = [2, 8, 8], strides = [1, 1, 1]} : vector<2x8x32xbf16> to vector<2x8x8xbf16>
    %17 = vector.extract_strided_slice %14 {offsets = [0, 0, 16], sizes = [2, 8, 8], strides = [1, 1, 1]} : vector<2x8x32xbf16> to vector<2x8x8xbf16>
    %18 = vector.extract_strided_slice %14 {offsets = [0, 0, 24], sizes = [2, 8, 8], strides = [1, 1, 1]} : vector<2x8x32xbf16> to vector<2x8x8xbf16>
    %19 = tpu.concatenate %15, %16, %17, %18 in 0 : vector<2x8x8xbf16>, vector<2x8x8xbf16>, vector<2x8x8xbf16>, vector<2x8x8xbf16> -> vector<8x8x8xbf16>
    %20 = arith.truncf %10 : vector<16x32xf32> to vector<16x32xbf16>
    %21 = vector.shape_cast %20 : vector<16x32xbf16> to vector<2x8x32xbf16>
    %22 = vector.extract_strided_slice %21 {offsets = [0, 0, 0], sizes = [2, 8, 8], strides = [1, 1, 1]} : vector<2x8x32xbf16> to vector<2x8x8xbf16>
    %23 = vector.extract_strided_slice %21 {offsets = [0, 0, 8], sizes = [2, 8, 8], strides = [1, 1, 1]} : vector<2x8x32xbf16> to vector<2x8x8xbf16>
    %24 = vector.extract_strided_slice %21 {offsets = [0, 0, 16], sizes = [2, 8, 8], strides = [1, 1, 1]} : vector<2x8x32xbf16> to vector<2x8x8xbf16>
    %25 = vector.extract_strided_slice %21 {offsets = [0, 0, 24], sizes = [2, 8, 8], strides = [1, 1, 1]} : vector<2x8x32xbf16> to vector<2x8x8xbf16>
    %26 = tpu.concatenate %22, %23, %24, %25 in 0 : vector<2x8x8xbf16>, vector<2x8x8xbf16>, vector<2x8x8xbf16>, vector<2x8x8xbf16> -> vector<8x8x8xbf16>
    %27 = arith.truncf %12 : vector<16x32xf32> to vector<16x32xbf16>
    %28 = vector.shape_cast %27 : vector<16x32xbf16> to vector<2x8x32xbf16>
    %29 = vector.extract_strided_slice %28 {offsets = [0, 0, 0], sizes = [2, 8, 8], strides = [1, 1, 1]} : vector<2x8x32xbf16> to vector<2x8x8xbf16>
    %30 = vector.extract_strided_slice %28 {offsets = [0, 0, 8], sizes = [2, 8, 8], strides = [1, 1, 1]} : vector<2x8x32xbf16> to vector<2x8x8xbf16>
    %31 = vector.extract_strided_slice %28 {offsets = [0, 0, 16], sizes = [2, 8, 8], strides = [1, 1, 1]} : vector<2x8x32xbf16> to vector<2x8x8xbf16>
    %32 = vector.extract_strided_slice %28 {offsets = [0, 0, 24], sizes = [2, 8, 8], strides = [1, 1, 1]} : vector<2x8x32xbf16> to vector<2x8x8xbf16>
    %33 = tpu.concatenate %29, %30, %31, %32 in 0 : vector<2x8x8xbf16>, vector<2x8x8xbf16>, vector<2x8x8xbf16>, vector<2x8x8xbf16> -> vector<8x8x8xbf16>
    "tpu.trace_start"() <{level = 10 : i32, message = "bqd,bkd->bqk"}> : () -> ()
    %cst_16 = arith.constant dense<0.000000e+00> : vector<8x8x8xf32>
    %34 = tpu.matmul %19, %26, %cst_16 {dimension_numbers = #tpu.dot_dimension_numbers<[2], [2], [1], [1], [0, 0, 0, 1, 1, 1], [0], [0]>} : vector<8x8x8xbf16>, vector<8x8x8xbf16>, vector<8x8x8xf32> -> vector<8x8x8xf32>
    "tpu.trace_stop"() : () -> ()
    %35 = tpu.iota {dimensions = array<i32: 0>} : vector<8x8xi32>
    %36 = tpu.iota {dimensions = array<i32: 1>} : vector<8x8xi32>
    %37 = arith.cmpi sgt, %36, %35 : vector<8x8xi32>
    %c0_17 = arith.constant 0 : index
    %c0_18 = arith.constant 0 : index
    %c0_19 = arith.constant 0 : index
    %38 = vector.load %arg4[%c0_17, %c0_18, %c0_19] : memref<2x1x8xf32, #tpu.memory_space<vmem>>, vector<2x1x8xf32>
    %cst_20 = arith.constant 0.000000e+00 : f32
    %39 = vector.broadcast %cst_20 : f32 to vector<2x1x8xf32>
    %40 = arith.cmpf oeq, %38, %39 : vector<2x1x8xf32>
    %41 = vector.shape_cast %37 : vector<8x8xi1> to vector<1x8x8xi1>
    %42 = vector.broadcast %41 : vector<1x8x8xi1> to vector<2x8x8xi1>
    %43 = vector.broadcast %40 : vector<2x1x8xi1> to vector<2x8x8xi1>
    %44 = arith.ori %42, %43 : vector<2x8x8xi1>
    %45 = vector.shape_cast %44 : vector<2x8x8xi1> to vector<1x2x8x8xi1>
    %46 = vector.shape_cast %45 : vector<1x2x8x8xi1> to vector<1x2x8x8xi1>
    %47 = vector.broadcast %46 : vector<1x2x8x8xi1> to vector<4x2x8x8xi1>
    %48 = vector.shape_cast %47 : vector<4x2x8x8xi1> to vector<8x8x8xi1>
    %cst_21 = arith.constant -1.000000e+09 : f32
    %49 = vector.broadcast %cst_21 : f32 to vector<8x8x8xf32>
    %50 = arith.select %48, %49, %34 : vector<8x8x8xi1>, vector<8x8x8xf32>
    %cst_22 = arith.constant dense<0xFF800000> : vector<8x8xf32>
    %51 = vector.multi_reduction <maximumf>, %50, %cst_22 [2] : vector<8x8x8xf32> to vector<8x8xf32>
    %52 = vector.shape_cast %51 : vector<8x8xf32> to vector<8x8x1xf32>
    %53 = vector.broadcast %52 : vector<8x8x1xf32> to vector<8x8x8xf32>
    %54 = arith.subf %50, %53 : vector<8x8x8xf32>
    %55 = math.exp %54 : vector<8x8x8xf32>
    %cst_23 = arith.constant dense<0.000000e+00> : vector<8x8xf32>
    %56 = vector.multi_reduction <add>, %55, %cst_23 [2] : vector<8x8x8xf32> to vector<8x8xf32>
    %57 = vector.shape_cast %56 : vector<8x8xf32> to vector<8x8x1xf32>
    %58 = tpu.reciprocal %57 {approx = true} : vector<8x8x1xf32> -> vector<8x8x1xf32>
    %59 = vector.broadcast %58 : vector<8x8x1xf32> to vector<8x8x8xf32>
    %60 = arith.mulf %55, %59 : vector<8x8x8xf32>
    %61 = arith.truncf %60 : vector<8x8x8xf32> to vector<8x8x8xbf16>
    "tpu.trace_start"() <{level = 10 : i32, message = "bqk,bkd->bqd"}> : () -> ()
    %cst_24 = arith.constant dense<0.000000e+00> : vector<8x8x8xf32>
    %62 = tpu.matmul %61, %33, %cst_24 {dimension_numbers = #tpu.dot_dimension_numbers<[2], [1], [1], [2], [0, 0, 0, 1, 1, 2], [0], [0]>} : vector<8x8x8xbf16>, vector<8x8x8xbf16>, vector<8x8x8xf32> -> vector<8x8x8xf32>
    "tpu.trace_stop"() : () -> ()
    %63 = vector.extract_strided_slice %62 {offsets = [0, 0, 0], sizes = [2, 8, 8], strides = [1, 1, 1]} : vector<8x8x8xf32> to vector<2x8x8xf32>
    %64 = vector.extract_strided_slice %62 {offsets = [2, 0, 0], sizes = [2, 8, 8], strides = [1, 1, 1]} : vector<8x8x8xf32> to vector<2x8x8xf32>
    %65 = vector.extract_strided_slice %62 {offsets = [4, 0, 0], sizes = [2, 8, 8], strides = [1, 1, 1]} : vector<8x8x8xf32> to vector<2x8x8xf32>
    %66 = vector.extract_strided_slice %62 {offsets = [6, 0, 0], sizes = [2, 8, 8], strides = [1, 1, 1]} : vector<8x8x8xf32> to vector<2x8x8xf32>
    %67 = tpu.concatenate %63, %64, %65, %66 in 2 : vector<2x8x8xf32>, vector<2x8x8xf32>, vector<2x8x8xf32>, vector<2x8x8xf32> -> vector<2x8x32xf32>
    %68 = vector.shape_cast %67 : vector<2x8x32xf32> to vector<16x32xf32>
    %69 = arith.truncf %68 : vector<16x32xf32> to vector<16x32xbf16>
    %c0_25 = arith.constant 0 : index
    %c0_26 = arith.constant 0 : index
    %70 = vector.load %arg8[%c0_25, %c0_26] : memref<32x32xbf16, #tpu.memory_space<vmem>>, vector<32x32xbf16>
    %cst_27 = arith.constant dense<0.000000e+00> : vector<16x32xf32>
    %71 = tpu.matmul %69, %70, %cst_27 {dimension_numbers = #tpu.dot_dimension_numbers<[1], [0], [0], [1], [0, 0, 1, 1], [], []>} : vector<16x32xbf16>, vector<32x32xbf16>, vector<16x32xf32> -> vector<16x32xf32>
    %c0_28 = arith.constant 0 : index
    %c0_29 = arith.constant 0 : index
    %72 = vector.load %arg9[%c0_28, %c0_29] : memref<1x32xf32, #tpu.memory_space<vmem>>, vector<1x32xf32>
    %73 = vector.broadcast %72 : vector<1x32xf32> to vector<16x32xf32>
    %74 = arith.addf %71, %73 : vector<16x32xf32>
    %75 = arith.addf %74, %5 : vector<16x32xf32>
    %c0_30 = arith.constant 0 : index
    %c0_31 = arith.constant 0 : index
    %76 = vector.load %arg10[%c0_30, %c0_31] : memref<1x32xf32, #tpu.memory_space<vmem>>, vector<1x32xf32>
    %c0_32 = arith.constant 0 : index
    %c0_33 = arith.constant 0 : index
    %77 = vector.load %arg11[%c0_32, %c0_33] : memref<1x32xf32, #tpu.memory_space<vmem>>, vector<1x32xf32>
    %cst_34 = arith.constant dense<0.000000e+00> : vector<16xf32>
    %78 = vector.multi_reduction <add>, %75, %cst_34 [1] : vector<16x32xf32> to vector<16xf32>
    %79 = vector.shape_cast %78 : vector<16xf32> to vector<16x1xf32>
    %cst_35 = arith.constant 3.200000e+01 : f32
    %80 = vector.broadcast %cst_35 : f32 to vector<16x1xf32>
    %81 = arith.divf %79, %80 : vector<16x1xf32>
    %82 = vector.broadcast %81 : vector<16x1xf32> to vector<16x32xf32>
    %83 = arith.subf %75, %82 : vector<16x32xf32>
    %84 = arith.mulf %83, %83 : vector<16x32xf32>
    %cst_36 = arith.constant dense<0.000000e+00> : vector<16xf32>
    %85 = vector.multi_reduction <add>, %84, %cst_36 [1] : vector<16x32xf32> to vector<16xf32>
    %86 = vector.shape_cast %85 : vector<16xf32> to vector<16x1xf32>
    %cst_37 = arith.constant 3.200000e+01 : f32
    %87 = vector.broadcast %cst_37 : f32 to vector<16x1xf32>
    %88 = arith.divf %86, %87 : vector<16x1xf32>
    %89 = vector.broadcast %81 : vector<16x1xf32> to vector<16x32xf32>
    %90 = arith.subf %75, %89 : vector<16x32xf32>
    %cst_38 = arith.constant 9.99999997E-7 : f32
    %91 = vector.broadcast %cst_38 : f32 to vector<16x1xf32>
    %92 = arith.addf %88, %91 : vector<16x1xf32>
    %93 = math.rsqrt %92 : vector<16x1xf32>
    %94 = vector.broadcast %93 : vector<16x1xf32> to vector<16x32xf32>
    %95 = arith.mulf %90, %94 : vector<16x32xf32>
    %96 = vector.broadcast %76 : vector<1x32xf32> to vector<16x32xf32>
    %97 = arith.mulf %95, %96 : vector<16x32xf32>
    %98 = vector.broadcast %77 : vector<1x32xf32> to vector<16x32xf32>
    %99 = arith.addf %97, %98 : vector<16x32xf32>
    %100 = vector.broadcast %4 : vector<16x1xf32> to vector<16x32xf32>
    %101 = arith.mulf %99, %100 : vector<16x32xf32>
    %102 = arith.truncf %101 : vector<16x32xf32> to vector<16x32xbf16>
    %c0_39 = arith.constant 0 : index
    %c0_40 = arith.constant 0 : index
    %103 = vector.load %arg12[%c0_39, %c0_40] : memref<32x64xbf16, #tpu.memory_space<vmem>>, vector<32x64xbf16>
    %cst_41 = arith.constant dense<0.000000e+00> : vector<16x64xf32>
    %104 = tpu.matmul %102, %103, %cst_41 {dimension_numbers = #tpu.dot_dimension_numbers<[1], [0], [0], [1], [0, 0, 1, 1], [], []>} : vector<16x32xbf16>, vector<32x64xbf16>, vector<16x64xf32> -> vector<16x64xf32>
    %c0_42 = arith.constant 0 : index
    %c0_43 = arith.constant 0 : index
    %105 = vector.load %arg13[%c0_42, %c0_43] : memref<1x64xf32, #tpu.memory_space<vmem>>, vector<1x64xf32>
    %106 = vector.broadcast %105 : vector<1x64xf32> to vector<16x64xf32>
    %107 = arith.addf %104, %106 : vector<16x64xf32>
    %cst_44 = arith.constant 5.000000e-01 : f32
    %108 = vector.broadcast %cst_44 : f32 to vector<16x64xf32>
    %109 = arith.mulf %108, %107 : vector<16x64xf32>
    %cst_45 = arith.constant 4.471500e-02 : f32
    %110 = vector.broadcast %cst_45 : f32 to vector<16x64xf32>
    %111 = arith.mulf %110, %107 : vector<16x64xf32>
    %112 = arith.mulf %111, %107 : vector<16x64xf32>
    %113 = arith.mulf %112, %107 : vector<16x64xf32>
    %114 = arith.addf %107, %113 : vector<16x64xf32>
    %cst_46 = arith.constant 0.797884583 : f32
    %115 = vector.broadcast %cst_46 : f32 to vector<16x64xf32>
    %116 = arith.mulf %115, %114 : vector<16x64xf32>
    %117 = math.tanh %116 : vector<16x64xf32>
    %cst_47 = arith.constant 1.000000e+00 : f32
    %118 = vector.broadcast %cst_47 : f32 to vector<16x64xf32>
    %119 = arith.addf %118, %117 : vector<16x64xf32>
    %120 = arith.mulf %109, %119 : vector<16x64xf32>
    %121 = arith.truncf %120 : vector<16x64xf32> to vector<16x64xbf16>
    %c0_48 = arith.constant 0 : index
    %c0_49 = arith.constant 0 : index
    %122 = vector.load %arg14[%c0_48, %c0_49] : memref<64x32xbf16, #tpu.memory_space<vmem>>, vector<64x32xbf16>
    %cst_50 = arith.constant dense<0.000000e+00> : vector<16x32xf32>
    %123 = tpu.matmul %121, %122, %cst_50 {dimension_numbers = #tpu.dot_dimension_numbers<[1], [0], [0], [1], [0, 0, 1, 1], [], []>} : vector<16x64xbf16>, vector<64x32xbf16>, vector<16x32xf32> -> vector<16x32xf32>
    %c0_51 = arith.constant 0 : index
    %c0_52 = arith.constant 0 : index
    %124 = vector.load %arg15[%c0_51, %c0_52] : memref<1x32xf32, #tpu.memory_space<vmem>>, vector<1x32xf32>
    %125 = vector.broadcast %124 : vector<1x32xf32> to vector<16x32xf32>
    %126 = arith.addf %123, %125 : vector<16x32xf32>
    %127 = arith.addf %126, %101 : vector<16x32xf32>
    %c0_53 = arith.constant 0 : index
    %c0_54 = arith.constant 0 : index
    %128 = vector.load %arg16[%c0_53, %c0_54] : memref<1x32xf32, #tpu.memory_space<vmem>>, vector<1x32xf32>
    %c0_55 = arith.constant 0 : index
    %c0_56 = arith.constant 0 : index
    %129 = vector.load %arg17[%c0_55, %c0_56] : memref<1x32xf32, #tpu.memory_space<vmem>>, vector<1x32xf32>
    %cst_57 = arith.constant dense<0.000000e+00> : vector<16xf32>
    %130 = vector.multi_reduction <add>, %127, %cst_57 [1] : vector<16x32xf32> to vector<16xf32>
    %131 = vector.shape_cast %130 : vector<16xf32> to vector<16x1xf32>
    %cst_58 = arith.constant 3.200000e+01 : f32
    %132 = vector.broadcast %cst_58 : f32 to vector<16x1xf32>
    %133 = arith.divf %131, %132 : vector<16x1xf32>
    %134 = vector.broadcast %133 : vector<16x1xf32> to vector<16x32xf32>
    %135 = arith.subf %127, %134 : vector<16x32xf32>
    %136 = arith.mulf %135, %135 : vector<16x32xf32>
    %cst_59 = arith.constant dense<0.000000e+00> : vector<16xf32>
    %137 = vector.multi_reduction <add>, %136, %cst_59 [1] : vector<16x32xf32> to vector<16xf32>
    %138 = vector.shape_cast %137 : vector<16xf32> to vector<16x1xf32>
    %cst_60 = arith.constant 3.200000e+01 : f32
    %139 = vector.broadcast %cst_60 : f32 to vector<16x1xf32>
    %140 = arith.divf %138, %139 : vector<16x1xf32>
    %141 = vector.broadcast %133 : vector<16x1xf32> to vector<16x32xf32>
    %142 = arith.subf %127, %141 : vector<16x32xf32>
    %cst_61 = arith.constant 9.99999997E-7 : f32
    %143 = vector.broadcast %cst_61 : f32 to vector<16x1xf32>
    %144 = arith.addf %140, %143 : vector<16x1xf32>
    %145 = math.rsqrt %144 : vector<16x1xf32>
    %146 = vector.broadcast %145 : vector<16x1xf32> to vector<16x32xf32>
    %147 = arith.mulf %142, %146 : vector<16x32xf32>
    %148 = vector.broadcast %128 : vector<1x32xf32> to vector<16x32xf32>
    %149 = arith.mulf %147, %148 : vector<16x32xf32>
    %150 = vector.broadcast %129 : vector<1x32xf32> to vector<16x32xf32>
    %151 = arith.addf %149, %150 : vector<16x32xf32>
    %152 = vector.broadcast %4 : vector<16x1xf32> to vector<16x32xf32>
    %153 = arith.mulf %151, %152 : vector<16x32xf32>
    %154 = vector.shape_cast %153 : vector<16x32xf32> to vector<2x8x32xf32>
    %c0_62 = arith.constant 0 : index
    %c0_63 = arith.constant 0 : index
    %c0_64 = arith.constant 0 : index
    %155 = vector.load %arg18[%c0_62, %c0_63, %c0_64] : memref<2x8x32xf32, #tpu.memory_space<vmem>>, vector<2x8x32xf32>
    tpu.vector_store %arg18[%c0_62, %c0_63, %c0_64], %154 {strides = array<i32>} : memref<2x8x32xf32, #tpu.memory_space<vmem>>, vector<2x8x32xf32>,
    return
  }
  func.func @transform_0(%arg0: i32) -> (i32, i32, i32) {
    %c0_i32 = arith.constant 0 : i32
    %c0_i32_0 = arith.constant 0 : i32
    %c0_i32_1 = arith.constant 0 : i32
    return %arg0, %c0_i32, %c0_i32_0 : i32, i32, i32
  }
  func.func @transform_1(%arg0: i32) -> (i32, i32, i32) {
    %c0_i32 = arith.constant 0 : i32
    %c0_i32_0 = arith.constant 0 : i32
    %c0_i32_1 = arith.constant 0 : i32
    return %arg0, %c0_i32, %c0_i32_0 : i32, i32, i32
  }
  func.func @transform_2(%arg0: i32) -> (i32, i32, i32) {
    %c0_i32 = arith.constant 0 : i32
    %c0_i32_0 = arith.constant 0 : i32
    %c0_i32_1 = arith.constant 0 : i32
    return %arg0, %c0_i32, %c0_i32_0 : i32, i32, i32
  }
  func.func @transform_3(%arg0: i32) -> (i32, i32, i32) {
    %c0_i32 = arith.constant 0 : i32
    %c0_i32_0 = arith.constant 0 : i32
    %c0_i32_1 = arith.constant 0 : i32
    return %arg0, %c0_i32, %c0_i32_0 : i32, i32, i32
  }
  func.func @transform_4(%arg0: i32) -> (i32, i32) {
    %c0_i32 = arith.constant 0 : i32
    %c0_i32_0 = arith.constant 0 : i32
    %c0_i32_1 = arith.constant 0 : i32
    return %c0_i32, %c0_i32_0 : i32, i32
  }
  func.func @transform_5(%arg0: i32) -> (i32, i32) {
    %c0_i32 = arith.constant 0 : i32
    %c0_i32_0 = arith.constant 0 : i32
    %c0_i32_1 = arith.constant 0 : i32
    return %c0_i32, %c0_i32_0 : i32, i32
  }
  func.func @transform_6(%arg0: i32) -> (i32, i32) {
    %c0_i32 = arith.constant 0 : i32
    %c0_i32_0 = arith.constant 0 : i32
    %c0_i32_1 = arith.constant 0 : i32
    return %c0_i32, %c0_i32_0 : i32, i32
  }
  func.func @transform_7(%arg0: i32) -> (i32, i32) {
    %c0_i32 = arith.constant 0 : i32
    %c0_i32_0 = arith.constant 0 : i32
    %c0_i32_1 = arith.constant 0 : i32
    return %c0_i32, %c0_i32_0 : i32, i32
  }
  func.func @transform_8(%arg0: i32) -> (i32, i32) {
    %c0_i32 = arith.constant 0 : i32
    %c0_i32_0 = arith.constant 0 : i32
    %c0_i32_1 = arith.constant 0 : i32
    return %c0_i32, %c0_i32_0 : i32, i32
  }
  func.func @transform_9(%arg0: i32) -> (i32, i32) {
    %c0_i32 = arith.constant 0 : i32
    %c0_i32_0 = arith.constant 0 : i32
    %c0_i32_1 = arith.constant 0 : i32
    return %c0_i32, %c0_i32_0 : i32, i32
  }
  func.func @transform_10(%arg0: i32) -> (i32, i32) {
    %c0_i32 = arith.constant 0 : i32
    %c0_i32_0 = arith.constant 0 : i32
    %c0_i32_1 = arith.constant 0 : i32
    return %c0_i32, %c0_i32_0 : i32, i32
  }
  func.func @transform_11(%arg0: i32) -> (i32, i32) {
    %c0_i32 = arith.constant 0 : i32
    %c0_i32_0 = arith.constant 0 : i32
    %c0_i32_1 = arith.constant 0 : i32
    return %c0_i32, %c0_i32_0 : i32, i32
  }
  func.func @transform_12(%arg0: i32) -> (i32, i32) {
    %c0_i32 = arith.constant 0 : i32
    %c0_i32_0 = arith.constant 0 : i32
    %c0_i32_1 = arith.constant 0 : i32
    return %c0_i32, %c0_i32_0 : i32, i32
  }
  func.func @transform_13(%arg0: i32) -> (i32, i32) {
    %c0_i32 = arith.constant 0 : i32
    %c0_i32_0 = arith.constant 0 : i32
    %c0_i32_1 = arith.constant 0 : i32
    return %c0_i32, %c0_i32_0 : i32, i32
  }
  func.func @transform_14(%arg0: i32) -> (i32, i32) {
    %c0_i32 = arith.constant 0 : i32
    %c0_i32_0 = arith.constant 0 : i32
    %c0_i32_1 = arith.constant 0 : i32
    return %c0_i32, %c0_i32_0 : i32, i32
  }
  func.func @transform_15(%arg0: i32) -> (i32, i32) {
    %c0_i32 = arith.constant 0 : i32
    %c0_i32_0 = arith.constant 0 : i32
    %c0_i32_1 = arith.constant 0 : i32
    return %c0_i32, %c0_i32_0 : i32, i32
  }
  func.func @transform_16(%arg0: i32) -> (i32, i32) {
    %c0_i32 = arith.constant 0 : i32
    %c0_i32_0 = arith.constant 0 : i32
    %c0_i32_1 = arith.constant 0 : i32
    return %c0_i32, %c0_i32_0 : i32, i32
  }
  func.func @transform_17(%arg0: i32) -> (i32, i32, i32) {
    %c0_i32 = arith.constant 0 : i32
    %c0_i32_0 = arith.constant 0 : i32
    %c0_i32_1 = arith.constant 0 : i32
    return %arg0, %c0_i32, %c0_i32_0 : i32, i32, i32
  }
}

module attributes {stable_mosaic.version = 11 : i64} {
  func.func @encoder_layer_kernel(%arg0: i32, %arg1: memref<2x8x32xf32, #tpu.memory_space<vmem>>, %arg2: memref<2x8x32xf32, #tpu.memory_space<vmem>>, %arg3: memref<2x8x1xf32, #tpu.memory_space<vmem>>, %arg4: memref<2x1x8xf32, #tpu.memory_space<vmem>>, %arg5: memref<32x32xbf16, #tpu.memory_space<vmem>>, %arg6: memref<32x32xbf16, #tpu.memory_space<vmem>>, %arg7: memref<32x32xbf16, #tpu.memory_space<vmem>>, %arg8: memref<32x32xbf16, #tpu.memory_space<vmem>>, %arg9: memref<1x32xf32, #tpu.memory_space<vmem>>, %arg10: memref<1x32xf32, #tpu.memory_space<vmem>>, %arg11: memref<1x32xf32, #tpu.memory_space<vmem>>, %arg12: memref<32x64xbf16, #tpu.memory_space<vmem>>, %arg13: memref<1x64xf32, #tpu.memory_space<vmem>>, %arg14: memref<64x32xbf16, #tpu.memory_space<vmem>>, %arg15: memref<1x32xf32, #tpu.memory_space<vmem>>, %arg16: memref<1x32xf32, #tpu.memory_space<vmem>>, %arg17: memref<1x32xf32, #tpu.memory_space<vmem>>, %arg18: memref<2x8x32xf32, #tpu.memory_space<vmem>>) attributes {dimension_semantics = [#tpu.dimension_semantics<parallel>], iteration_bounds = array<i64: 1>, scalar_prefetch = 0 : i64, scratch_operands = 0 : i64, tpu.core_type = #tpu.core_type<tc>, window_params = [{transform_indices = @transform_0, window_bounds = array<i64: 2, 8, 32>}, {transform_indices = @transform_1, window_bounds = array<i64: 2, 8, 32>}, {transform_indices = @transform_2, window_bounds = array<i64: 2, 8, 1>}, {transform_indices = @transform_3, window_bounds = array<i64: 2, 1, 8>}, {pipeline_mode = #tpu.pipeline_mode<synchronous>, transform_indices = @transform_4, window_bounds = array<i64: 32, 32>}, {pipeline_mode = #tpu.pipeline_mode<synchronous>, transform_indices = @transform_5, window_bounds = array<i64: 32, 32>}, {pipeline_mode = #tpu.pipeline_mode<synchronous>, transform_indices = @transform_6, window_bounds = array<i64: 32, 32>}, {pipeline_mode = #tpu.pipeline_mode<synchronous>, transform_indices = @transform_7, window_bounds = array<i64: 32, 32>}, {pipeline_mode = #tpu.pipeline_mode<synchronous>, transform_indices = @transform_8, window_bounds = array<i64: 1, 32>}, {pipeline_mode = #tpu.pipeline_mode<synchronous>, transform_indices = @transform_9, window_bounds = array<i64: 1, 32>}, {pipeline_mode = #tpu.pipeline_mode<synchronous>, transform_indices = @transform_10, window_bounds = array<i64: 1, 32>}, {pipeline_mode = #tpu.pipeline_mode<synchronous>, transform_indices = @transform_11, window_bounds = array<i64: 32, 64>}, {pipeline_mode = #tpu.pipeline_mode<synchronous>, transform_indices = @transform_12, window_bounds = array<i64: 1, 64>}, {pipeline_mode = #tpu.pipeline_mode<synchronous>, transform_indices = @transform_13, window_bounds = array<i64: 64, 32>}, {pipeline_mode = #tpu.pipeline_mode<synchronous>, transform_indices = @transform_14, window_bounds = array<i64: 1, 32>}, {pipeline_mode = #tpu.pipeline_mode<synchronous>, transform_indices = @transform_15, window_bounds = array<i64: 1, 32>}, {pipeline_mode = #tpu.pipeline_mode<synchronous>, transform_indices = @transform_16, window_bounds = array<i64: 1, 32>}, {transform_indices = @transform_17, window_bounds = array<i64: 2, 8, 32>}]} {
    %c0 = arith.constant 0 : index
    %c0_0 = arith.constant 0 : index
    %c0_1 = arith.constant 0 : index
    %0 = vector.load %arg1[%c0, %c0_0, %c0_1] : memref<2x8x32xf32, #tpu.memory_space<vmem>>, vector<2x8x32xf32>
    %c0_2 = arith.constant 0 : index
    %c0_3 = arith.constant 0 : index
    %c0_4 = arith.constant 0 : index
    %1 = vector.load %arg2[%c0_2, %c0_3, %c0_4] : memref<2x8x32xf32, #tpu.memory_space<vmem>>, vector<2x8x32xf32>
    %2 = arith.addf %0, %1 : vector<2x8x32xf32>
    %c0_5 = arith.constant 0 : index
    %c0_6 = arith.constant 0 : index
    %c0_7 = arith.constant 0 : index
    %3 = vector.load %arg3[%c0_5, %c0_6, %c0_7] : memref<2x8x1xf32, #tpu.memory_space<vmem>>, vector<2x8x1xf32>
    %4 = vector.shape_cast %3 : vector<2x8x1xf32> to vector<16x1xf32>
    %5 = vector.shape_cast %2 : vector<2x8x32xf32> to vector<16x32xf32>
    %6 = arith.truncf %5 : vector<16x32xf32> to vector<16x32xbf16>
    %c0_8 = arith.constant 0 : index
    %c0_9 = arith.constant 0 : index
    %7 = vector.load %arg5[%c0_8, %c0_9] : memref<32x32xbf16, #tpu.memory_space<vmem>>, vector<32x32xbf16>
    %cst = arith.constant dense<0.000000e+00> : vector<16x32xf32>
    %8 = tpu.matmul %6, %7, %cst {dimension_numbers = #tpu.dot_dimension_numbers<[1], [0], [0], [1], [0, 0, 1, 1], [], []>} : vector<16x32xbf16>, vector<32x32xbf16>, vector<16x32xf32> -> vector<16x32xf32>
    %c0_10 = arith.constant 0 : index
    %c0_11 = arith.constant 0 : index
    %9 = vector.load %arg6[%c0_10, %c0_11] : memref<32x32xbf16, #tpu.memory_space<vmem>>, vector<32x32xbf16>
    %cst_12 = arith.constant dense<0.000000e+00> : vector<16x32xf32>
    %10 = tpu.matmul %6, %9, %cst_12 {dimension_numbers = #tpu.dot_dimension_numbers<[1], [0], [0], [1], [0, 0, 1, 1], [], []>} : vector<16x32xbf16>, vector<32x32xbf16>, vector<16x32xf32> -> vector<16x32xf32>
    %c0_13 = arith.constant 0 : index
    %c0_14 = arith.constant 0 : index
    %11 = vector.load %arg7[%c0_13, %c0_14] : memref<32x32xbf16, #tpu.memory_space<vmem>>, vector<32x32xbf16>
    %cst_15 = arith.constant dense<0.000000e+00> : vector<16x32xf32>
    %12 = tpu.matmul %6, %11, %cst_15 {dimension_numbers = #tpu.dot_dimension_numbers<[1], [0], [0], [1], [0, 0, 1, 1], [], []>} : vector<16x32xbf16>, vector<32x32xbf16>, vector<16x32xf32> -> vector<16x32xf32>
    %13 = arith.truncf %8 : vector<16x32xf32> to vector<16x32xbf16>
    %14 = vector.shape_cast %13 : vector<16x32xbf16> to vector<2x8x32xbf16>
    %15 = vector.extract_strided_slice %14 {offsets = [0, 0, 0], sizes = [2, 8, 8], strides = [1, 1, 1]} : vector<2x8x32xbf16> to vector<2x8x8xbf16>
    %16 = vector.extract_strided_slice %14 {offsets = [0, 0, 8], sizes = [2, 8, 8], strides = [1, 1, 1]} : vector<2x8x32xbf16> to vector<2x8x8xbf16>
    %17 = vector.extract_strided_slice %14 {offsets = [0, 0, 16], sizes = [2, 8, 8], strides = [1, 1, 1]} : vector<2x8x32xbf16> to vector<2x8x8xbf16>
    %18 = vector.extract_strided_slice %14 {offsets = [0, 0, 24], sizes = [2, 8, 8], strides = [1, 1, 1]} : vector<2x8x32xbf16> to vector<2x8x8xbf16>
    %19 = tpu.concatenate %15, %16, %17, %18 in 0 : vector<2x8x8xbf16>, vector<2x8x8xbf16>, vector<2x8x8xbf16>, vector<2x8x8xbf16> -> vector<8x8x8xbf16>
    %20 = arith.truncf %10 : vector<16x32xf32> to vector<16x32xbf16>
    %21 = vector.shape_cast %20 : vector<16x32xbf16> to vector<2x8x32xbf16>
    %22 = vector.extract_strided_slice %21 {offsets = [0, 0, 0], sizes = [2, 8, 8], strides = [1, 1, 1]} : vector<2x8x32xbf16> to vector<2x8x8xbf16>
    %23 = vector.extract_strided_slice %21 {offsets = [0, 0, 8], sizes = [2, 8, 8], strides = [1, 1, 1]} : vector<2x8x32xbf16> to vector<2x8x8xbf16>
    %24 = vector.extract_strided_slice %21 {offsets = [0, 0, 16], sizes = [2, 8, 8], strides = [1, 1, 1]} : vector<2x8x32xbf16> to vector<2x8x8xbf16>
    %25 = vector.extract_strided_slice %21 {offsets = [0, 0, 24], sizes = [2, 8, 8], strides = [1, 1, 1]} : vector<2x8x32xbf16> to vector<2x8x8xbf16>
    %26 = tpu.concatenate %22, %23, %24, %25 in 0 : vector<2x8x8xbf16>, vector<2x8x8xbf16>, vector<2x8x8xbf16>, vector<2x8x8xbf16> -> vector<8x8x8xbf16>
    %27 = arith.truncf %12 : vector<16x32xf32> to vector<16x32xbf16>
    %28 = vector.shape_cast %27 : vector<16x32xbf16> to vector<2x8x32xbf16>
    %29 = vector.extract_strided_slice %28 {offsets = [0, 0, 0], sizes = [2, 8, 8], strides = [1, 1, 1]} : vector<2x8x32xbf16> to vector<2x8x8xbf16>
    %30 = vector.extract_strided_slice %28 {offsets = [0, 0, 8], sizes = [2, 8, 8], strides = [1, 1, 1]} : vector<2x8x32xbf16> to vector<2x8x8xbf16>
    %31 = vector.extract_strided_slice %28 {offsets = [0, 0, 16], sizes = [2, 8, 8], strides = [1, 1, 1]} : vector<2x8x32xbf16> to vector<2x8x8xbf16>
    %32 = vector.extract_strided_slice %28 {offsets = [0, 0, 24], sizes = [2, 8, 8], strides = [1, 1, 1]} : vector<2x8x32xbf16> to vector<2x8x8xbf16>
    %33 = tpu.concatenate %29, %30, %31, %32 in 0 : vector<2x8x8xbf16>, vector<2x8x8xbf16>, vector<2x8x8xbf16>, vector<2x8x8xbf16> -> vector<8x8x8xbf16>
    "tpu.trace_start"() <{level = 10 : i32, message = "bqd,bkd->bqk"}> : () -> ()
    %cst_16 = arith.constant dense<0.000000e+00> : vector<8x8x8xf32>
    %34 = tpu.matmul %19, %26, %cst_16 {dimension_numbers = #tpu.dot_dimension_numbers<[2], [2], [1], [1], [0, 0, 0, 1, 1, 1], [0], [0]>} : vector<8x8x8xbf16>, vector<8x8x8xbf16>, vector<8x8x8xf32> -> vector<8x8x8xf32>
    "tpu.trace_stop"() : () -> ()
    %35 = tpu.iota {dimensions = array<i32: 0>} : vector<8x8xi32>
    %36 = tpu.iota {dimensions = array<i32: 1>} : vector<8x8xi32>
    %37 = arith.cmpi sgt, %36, %35 : vector<8x8xi32>
    %c0_17 = arith.constant 0 : index
    %c0_18 = arith.constant 0 : index
    %c0_19 = arith.constant 0 : index
    %38 = vector.load %arg4[%c0_17, %c0_18, %c0_19] : memref<2x1x8xf32, #tpu.memory_space<vmem>>, vector<2x1x8xf32>
    %cst_20 = arith.constant 0.000000e+00 : f32
    %39 = vector.broadcast %cst_20 : f32 to vector<2x1x8xf32>
    %40 = arith.cmpf oeq, %38, %39 : vector<2x1x8xf32>
    %41 = vector.shape_cast %37 : vector<8x8xi1> to vector<1x8x8xi1>
    %42 = vector.broadcast %41 : vector<1x8x8xi1> to vector<2x8x8xi1>
    %43 = vector.broadcast %40 : vector<2x1x8xi1> to vector<2x8x8xi1>
    %44 = arith.ori %42, %43 : vector<2x8x8xi1>
    %45 = vector.shape_cast %44 : vector<2x8x8xi1> to vector<1x2x8x8xi1>
    %46 = vector.shape_cast %45 : vector<1x2x8x8xi1> to vector<1x2x8x8xi1>
    %47 = vector.broadcast %46 : vector<1x2x8x8xi1> to vector<4x2x8x8xi1>
    %48 = vector.shape_cast %47 : vector<4x2x8x8xi1> to vector<8x8x8xi1>
    %cst_21 = arith.constant -1.000000e+09 : f32
    %49 = vector.broadcast %cst_21 : f32 to vector<8x8x8xf32>
    %50 = arith.select %48, %49, %34 : vector<8x8x8xi1>, vector<8x8x8xf32>
    %cst_22 = arith.constant dense<0xFF800000> : vector<8x8xf32>
    %51 = vector.multi_reduction <maximumf>, %50, %cst_22 [2] : vector<8x8x8xf32> to vector<8x8xf32>
    %52 = vector.shape_cast %51 : vector<8x8xf32> to vector<8x8x1xf32>
    %53 = vector.broadcast %52 : vector<8x8x1xf32> to vector<8x8x8xf32>
    %54 = arith.subf %50, %53 : vector<8x8x8xf32>
    %55 = math.exp %54 : vector<8x8x8xf32>
    %cst_23 = arith.constant dense<0.000000e+00> : vector<8x8xf32>
    %56 = vector.multi_reduction <add>, %55, %cst_23 [2] : vector<8x8x8xf32> to vector<8x8xf32>
    %57 = vector.shape_cast %56 : vector<8x8xf32> to vector<8x8x1xf32>
    %58 = tpu.reciprocal %57 {approx = true} : vector<8x8x1xf32> -> vector<8x8x1xf32>
    %59 = vector.broadcast %58 : vector<8x8x1xf32> to vector<8x8x8xf32>
    %60 = arith.mulf %55, %59 : vector<8x8x8xf32>
    %61 = arith.truncf %60 : vector<8x8x8xf32> to vector<8x8x8xbf16>
    "tpu.trace_start"() <{level = 10 : i32, message = "bqk,bkd->bqd"}> : () -> ()
    %cst_24 = arith.constant dense<0.000000e+00> : vector<8x8x8xf32>
    %62 = tpu.matmul %61, %33, %cst_24 {dimension_numbers = #tpu.dot_dimension_numbers<[2], [1], [1], [2], [0, 0, 0, 1, 1, 2], [0], [0]>} : vector<8x8x8xbf16>, vector<8x8x8xbf16>, vector<8x8x8xf32> -> vector<8x8x8xf32>
    "tpu.trace_stop"() : () -> ()
    %63 = vector.extract_strided_slice %62 {offsets = [0, 0, 0], sizes = [2, 8, 8], strides = [1, 1, 1]} : vector<8x8x8xf32> to vector<2x8x8xf32>
    %64 = vector.extract_strided_slice %62 {offsets = [2, 0, 0], sizes = [2, 8, 8], strides = [1, 1, 1]} : vector<8x8x8xf32> to vector<2x8x8xf32>
    %65 = vector.extract_strided_slice %62 {offsets = [4, 0, 0], sizes = [2, 8, 8], strides = [1, 1, 1]} : vector<8x8x8xf32> to vector<2x8x8xf32>
    %66 = vector.extract_strided_slice %62 {offsets = [6, 0, 0], sizes = [2, 8, 8], strides = [1, 1, 1]} : vector<8x8x8xf32> to vector<2x8x8xf32>
    %67 = tpu.concatenate %63, %64, %65, %66 in 2 : vector<2x8x8xf32>, vector<2x8x8xf32>, vector<2x8x8xf32>, vector<2x8x8xf32> -> vector<2x8x32xf32>
    %68 = vector.shape_cast %67 : vector<2x8x32xf32> to vector<16x32xf32>
    %69 = arith.truncf %68 : vector<16x32xf32> to vector<16x32xbf16>
    %c0_25 = arith.constant 0 : index
    %c0_26 = arith.constant 0 : index
    %70 = vector.load %arg8[%c0_25, %c0_26] : memref<32x32xbf16, #tpu.memory_space<vmem>>, vector<32x32xbf16>
    %cst_27 = arith.constant dense<0.000000e+00> : vector<16x32xf32>
    %71 = tpu.matmul %69, %70, %cst_27 {dimension_numbers = #tpu.dot_dimension_numbers<[1], [0], [0], [1], [0, 0, 1, 1], [], []>} : vector<16x32xbf16>, vector<32x32xbf16>, vector<16x32xf32> -> vector<16x32xf32>
    %c0_28 = arith.constant 0 : index
    %c0_29 = arith.constant 0 : index
    %72 = vector.load %arg9[%c0_28, %c0_29] : memref<1x32xf32, #tpu.memory_space<vmem>>, vector<1x32xf32>
    %73 = vector.broadcast %72 : vector<1x32xf32> to vector<16x32xf32>
    %74 = arith.addf %71, %73 : vector<16x32xf32>
    %75 = arith.addf %74, %5 : vector<16x32xf32>
    %c0_30 = arith.constant 0 : index
    %c0_31 = arith.constant 0 : index
    %76 = vector.load %arg10[%c0_30, %c0_31] : memref<1x32xf32, #tpu.memory_space<vmem>>, vector<1x32xf32>
    %c0_32 = arith.constant 0 : index
    %c0_33 = arith.constant 0 : index
    %77 = vector.load %arg11[%c0_32, %c0_33] : memref<1x32xf32, #tpu.memory_space<vmem>>, vector<1x32xf32>
    %cst_34 = arith.constant dense<0.000000e+00> : vector<16xf32>
    %78 = vector.multi_reduction <add>, %75, %cst_34 [1] : vector<16x32xf32> to vector<16xf32>
    %79 = vector.shape_cast %78 : vector<16xf32> to vector<16x1xf32>
    %cst_35 = arith.constant 3.200000e+01 : f32
    %80 = vector.broadcast %cst_35 : f32 to vector<16x1xf32>
    %81 = arith.divf %79, %80 : vector<16x1xf32>
    %82 = vector.broadcast %81 : vector<16x1xf32> to vector<16x32xf32>
    %83 = arith.subf %75, %82 : vector<16x32xf32>
    %84 = arith.mulf %83, %83 : vector<16x32xf32>
    %cst_36 = arith.constant dense<0.000000e+00> : vector<16xf32>
    %85 = vector.multi_reduction <add>, %84, %cst_36 [1] : vector<16x32xf32> to vector<16xf32>
    %86 = vector.shape_cast %85 : vector<16xf32> to vector<16x1xf32>
    %cst_37 = arith.constant 3.200000e+01 : f32
    %87 = vector.broadcast %cst_37 : f32 to vector<16x1xf32>
    %88 = arith.divf %86, %87 : vector<16x1xf32>
    %89 = vector.broadcast %81 : vector<16x1xf32> to vector<16x32xf32>
    %90 = arith.subf %75, %89 : vector<16x32xf32>
    %cst_38 = arith.constant 9.99999997E-7 : f32
    %91 = vector.broadcast %cst_38 : f32 to vector<16x1xf32>
    %92 = arith.addf %88, %91 : vector<16x1xf32>
    %93 = math.rsqrt %92 : vector<16x1xf32>
    %94 = vector.broadcast %93 : vector<16x1xf32> to vector<16x32xf32>
    %95 = arith.mulf %90, %94 : vector<16x32xf32>
    %96 = vector.broadcast %76 : vector<1x32xf32> to vector<16x32xf32>
    %97 = arith.mulf %95, %96 : vector<16x32xf32>
    %98 = vector.broadcast %77 : vector<1x32xf32> to vector<16x32xf32>
    %99 = arith.addf %97, %98 : vector<16x32xf32>
    %100 = vector.broadcast %4 : vector<16x1xf32> to vector<16x32xf32>
    %101 = arith.mulf %99, %100 : vector<16x32xf32>
    %102 = arith.truncf %101 : vector<16x32xf32> to vector<16x32xbf16>
    %c0_39 = arith.constant 0 : index
    %c0_40 = arith.constant 0 : index
    %103 = vector.load %arg12[%c0_39, %c0_40] : memref<32x64xbf16, #tpu.memory_space<vmem>>, vector<32x64xbf16>
    %cst_41 = arith.constant dense<0.000000e+00> : vector<16x64xf32>
    %104 = tpu.matmul %102, %103, %cst_41 {dimension_numbers = #tpu.dot_dimension_numbers<[1], [0], [0], [1], [0, 0, 1, 1], [], []>} : vector<16x32xbf16>, vector<32x64xbf16>, vector<16x64xf32> -> vector<16x64xf32>
    %c0_42 = arith.constant 0 : index
    %c0_43 = arith.constant 0 : index
    %105 = vector.load %arg13[%c0_42, %c0_43] : memref<1x64xf32, #tpu.memory_space<vmem>>, vector<1x64xf32>
    %106 = vector.broadcast %105 : vector<1x64xf32> to vector<16x64xf32>
    %107 = arith.addf %104, %106 : vector<16x64xf32>
    %cst_44 = arith.constant 5.000000e-01 : f32
    %108 = vector.broadcast %cst_44 : f32 to vector<16x64xf32>
    %109 = arith.mulf %108, %107 : vector<16x64xf32>
    %cst_45 = arith.constant 4.471500e-02 : f32
    %110 = vector.broadcast %cst_45 : f32 to vector<16x64xf32>
    %111 = arith.mulf %110, %107 : vector<16x64xf32>
    %112 = arith.mulf %111, %107 : vector<16x64xf32>
    %113 = arith.mulf %112, %107 : vector<16x64xf32>
    %114 = arith.addf %107, %113 : vector<16x64xf32>
    %cst_46 = arith.constant 0.797884583 : f32
    %115 = vector.broadcast %cst_46 : f32 to vector<16x64xf32>
    %116 = arith.mulf %115, %114 : vector<16x64xf32>
    %117 = math.tanh %116 : vector<16x64xf32>
    %cst_47 = arith.constant 1.000000e+00 : f32
    %118 = vector.broadcast %cst_47 : f32 to vector<16x64xf32>
    %119 = arith.addf %118, %117 : vector<16x64xf32>
    %120 = arith.mulf %109, %119 : vector<16x64xf32>
    %121 = arith.truncf %120 : vector<16x64xf32> to vector<16x64xbf16>
    %c0_48 = arith.constant 0 : index
    %c0_49 = arith.constant 0 : index
    %122 = vector.load %arg14[%c0_48, %c0_49] : memref<64x32xbf16, #tpu.memory_space<vmem>>, vector<64x32xbf16>
    %cst_50 = arith.constant dense<0.000000e+00> : vector<16x32xf32>
    %123 = tpu.matmul %121, %122, %cst_50 {dimension_numbers = #tpu.dot_dimension_numbers<[1], [0], [0], [1], [0, 0, 1, 1], [], []>} : vector<16x64xbf16>, vector<64x32xbf16>, vector<16x32xf32> -> vector<16x32xf32>
    %c0_51 = arith.constant 0 : index
    %c0_52 = arith.constant 0 : index
    %124 = vector.load %arg15[%c0_51, %c0_52] : memref<1x32xf32, #tpu.memory_space<vmem>>, vector<1x32xf32>
    %125 = vector.broadcast %124 : vector<1x32xf32> to vector<16x32xf32>
    %126 = arith.addf %123, %125 : vector<16x32xf32>
    %127 = arith.addf %126, %101 : vector<16x32xf32>
    %c0_53 = arith.constant 0 : index
    %c0_54 = arith.constant 0 : index
    %128 = vector.load %arg16[%c0_53, %c0_54] : memref<1x32xf32, #tpu.memory_space<vmem>>, vector<1x32xf32>
    %c0_55 = arith.constant 0 : index
    %c0_56 = arith.constant 0 : index
    %129 = vector.load %arg17[%c0_55, %c0_56] : memref<1x32xf32, #tpu.memory_space<vmem>>, vector<1x32xf32>
    %cst_57 = arith.constant dense<0.000000e+00> : vector<16xf32>
    %130 = vector.multi_reduction <add>, %127, %cst_57 [1] : vector<16x32xf32> to vector<16xf32>
    %131 = vector.shape_cast %130 : vector<16xf32> to vector<16x1xf32>
    %cst_58 = arith.constant 3.200000e+01 : f32
    %132 = vector.broadcast %cst_58 : f32 to vector<16x1xf32>
    %133 = arith.divf %131, %132 : vector<16x1xf32>
    %134 = vector.broadcast %133 : vector<16x1xf32> to vector<16x32xf32>
    %135 = arith.subf %127, %134 : vector<16x32xf32>
    %136 = arith.mulf %135, %135 : vector<16x32xf32>
    %cst_59 = arith.constant dense<0.000000e+00> : vector<16xf32>
    %137 = vector.multi_reduction <add>, %136, %cst_59 [1] : vector<16x32xf32> to vector<16xf32>
    %138 = vector.shape_cast %137 : vector<16xf32> to vector<16x1xf32>
    %cst_60 = arith.constant 3.200000e+01 : f32
    %139 = vector.broadcast %cst_60 : f32 to vector<16x1xf32>
    %140 = arith.divf %138, %139 : vector<16x1xf32>
    %141 = vector.broadcast %133 : vector<16x1xf32> to vector<16x32xf32>
    %142 = arith.subf %127, %141 : vector<16x32xf32>
    %cst_61 = arith.constant 9.99999997E-7 : f32
    %143 = vector.broadcast %cst_61 : f32 to vector<16x1xf32>
    %144 = arith.addf %140, %143 : vector<16x1xf32>
    %145 = math.rsqrt %144 : vector<16x1xf32>
    %146 = vector.broadcast %145 : vector<16x1xf32> to vector<16x32xf32>
    %147 = arith.mulf %142, %146 : vector<16x32xf32>
    %148 = vector.broadcast %128 : vector<1x32xf32> to vector<16x32xf32>
    %149 = arith.mulf %147, %148 : vector<16x32xf32>
    %150 = vector.broadcast %129 : vector<1x32xf32> to vector<16x32xf32>
    %151 = arith.addf %149, %150 : vector<16x32xf32>
    %152 = vector.broadcast %4 : vector<16x1xf32> to vector<16x32xf32>
    %153 = arith.mulf %151, %152 : vector<16x32xf32>
    %154 = vector.shape_cast %153 : vector<16x32xf32> to vector<2x8x32xf32>
    %c0_62 = arith.constant 0 : index
    %c0_63 = arith.constant 0 : index
    %c0_64 = arith.constant 0 : index
    %155 = vector.load %arg18[%c0_62, %c0_63, %c0_64] : memref<2x8x32xf32, #tpu.memory_space<vmem>>, vector<2x8x32xf32>
    tpu.vector_store %arg18[%c0_62, %c0_63, %c0_64], %154 {strides = array<i32>} : memref<2x8x32xf32, #tpu.memory_space<vmem>>, vector<2x8x32xf32>,
    return
  }
  func.func @transform_0(%arg0: i32) -> (i32, i32, i32) {
    %c0_i32 = arith.constant 0 : i32
    %c0_i32_0 = arith.constant 0 : i32
    %c0_i32_1 = arith.constant 0 : i32
    return %arg0, %c0_i32, %c0_i32_0 : i32, i32, i32
  }
  func.func @transform_1(%arg0: i32) -> (i32, i32, i32) {
    %c0_i32 = arith.constant 0 : i32
    %c0_i32_0 = arith.constant 0 : i32
    %c0_i32_1 = arith.constant 0 : i32
    return %arg0, %c0_i32, %c0_i32_0 : i32, i32, i32
  }
  func.func @transform_2(%arg0: i32) -> (i32, i32, i32) {
    %c0_i32 = arith.constant 0 : i32
    %c0_i32_0 = arith.constant 0 : i32
    %c0_i32_1 = arith.constant 0 : i32
    return %arg0, %c0_i32, %c0_i32_0 : i32, i32, i32
  }
  func.func @transform_3(%arg0: i32) -> (i32, i32, i32) {
    %c0_i32 = arith.constant 0 : i32
    %c0_i32_0 = arith.constant 0 : i32
    %c0_i32_1 = arith.constant 0 : i32
    return %arg0, %c0_i32, %c0_i32_0 : i32, i32, i32
  }
  func.func @transform_4(%arg0: i32) -> (i32, i32) {
    %c0_i32 = arith.constant 0 : i32
    %c0_i32_0 = arith.constant 0 : i32
    %c0_i32_1 = arith.constant 0 : i32
    return %c0_i32, %c0_i32_0 : i32, i32
  }
  func.func @transform_5(%arg0: i32) -> (i32, i32) {
    %c0_i32 = arith.constant 0 : i32
    %c0_i32_0 = arith.constant 0 : i32
    %c0_i32_1 = arith.constant 0 : i32
    return %c0_i32, %c0_i32_0 : i32, i32
  }
  func.func @transform_6(%arg0: i32) -> (i32, i32) {
    %c0_i32 = arith.constant 0 : i32
    %c0_i32_0 = arith.constant 0 : i32
    %c0_i32_1 = arith.constant 0 : i32
    return %c0_i32, %c0_i32_0 : i32, i32
  }
  func.func @transform_7(%arg0: i32) -> (i32, i32) {
    %c0_i32 = arith.constant 0 : i32
    %c0_i32_0 = arith.constant 0 : i32
    %c0_i32_1 = arith.constant 0 : i32
    return %c0_i32, %c0_i32_0 : i32, i32
  }
  func.func @transform_8(%arg0: i32) -> (i32, i32) {
    %c0_i32 = arith.constant 0 : i32
    %c0_i32_0 = arith.constant 0 : i32
    %c0_i32_1 = arith.constant 0 : i32
    return %c0_i32, %c0_i32_0 : i32, i32
  }
  func.func @transform_9(%arg0: i32) -> (i32, i32) {
    %c0_i32 = arith.constant 0 : i32
    %c0_i32_0 = arith.constant 0 : i32
    %c0_i32_1 = arith.constant 0 : i32
    return %c0_i32, %c0_i32_0 : i32, i32
  }
  func.func @transform_10(%arg0: i32) -> (i32, i32) {
    %c0_i32 = arith.constant 0 : i32
    %c0_i32_0 = arith.constant 0 : i32
    %c0_i32_1 = arith.constant 0 : i32
    return %c0_i32, %c0_i32_0 : i32, i32
  }
  func.func @transform_11(%arg0: i32) -> (i32, i32) {
    %c0_i32 = arith.constant 0 : i32
    %c0_i32_0 = arith.constant 0 : i32
    %c0_i32_1 = arith.constant 0 : i32
    return %c0_i32, %c0_i32_0 : i32, i32
  }
  func.func @transform_12(%arg0: i32) -> (i32, i32) {
    %c0_i32 = arith.constant 0 : i32
    %c0_i32_0 = arith.constant 0 : i32
    %c0_i32_1 = arith.constant 0 : i32
    return %c0_i32, %c0_i32_0 : i32, i32
  }
  func.func @transform_13(%arg0: i32) -> (i32, i32) {
    %c0_i32 = arith.constant 0 : i32
    %c0_i32_0 = arith.constant 0 : i32
    %c0_i32_1 = arith.constant 0 : i32
    return %c0_i32, %c0_i32_0 : i32, i32
  }
  func.func @transform_14(%arg0: i32) -> (i32, i32) {
    %c0_i32 = arith.constant 0 : i32
    %c0_i32_0 = arith.constant 0 : i32
    %c0_i32_1 = arith.constant 0 : i32
    return %c0_i32, %c0_i32_0 : i32, i32
  }
  func.func @transform_15(%arg0: i32) -> (i32, i32) {
    %c0_i32 = arith.constant 0 : i32
    %c0_i32_0 = arith.constant 0 : i32
    %c0_i32_1 = arith.constant 0 : i32
    return %c0_i32, %c0_i32_0 : i32, i32
  }
  func.func @transform_16(%arg0: i32) -> (i32, i32) {
    %c0_i32 = arith.constant 0 : i32
    %c0_i32_0 = arith.constant 0 : i32
    %c0_i32_1 = arith.constant 0 : i32
    return %c0_i32, %c0_i32_0 : i32, i32
  }
  func.func @transform_17(%arg0: i32) -> (i32, i32, i32) {
    %c0_i32 = arith.constant 0 : i32
    %c0_i32_0 = arith.constant 0 : i32
    %c0_i32_1 = arith.constant 0 : i32
    return %arg0, %c0_i32, %c0_i32_0 : i32, i32, i32
  }
}

</mosaic_0001>

<bundles_post_ra>
// kernel: encoder_forward.2
= control target key start
LH: loop header
LB: loop body
LE: loop exit
PB: predicated region body
PF: predicated region fallthrough
CT: control target
= control target key end

     0   :  { %v1889_v0 = vmov 0.0   ;;  %vm1890_vm0 = vmmov 0   ;;  %vm82_vm1 = vcmask 261120   ;;  %vm295_vm2 = vcmask 64512   ;;  %s1896_s24 = smov 16   ;;  %s2322_s4 = inlined_call_operand.vmem [shape: bf16[32,32], index: 4, kind: input, shape index: {}]   ;;  %s2323_s5 = inlined_call_operand.vmem [shape: bf16[32,32], index: 5, kind: input, shape index: {}]   ;;  %s2324_s0 = inlined_call_operand.vmem [shape: f32[2,8,32], index: 0, kind: input, shape index: {}]   ;;  %s2325_s1 = inlined_call_operand.vmem [shape: f32[2,8,32], index: 1, kind: input, shape index: {}]   ;;  %s2326_s6 = inlined_call_operand.vmem [shape: bf16[32,32], index: 6, kind: input, shape index: {}]   ;;  %s2327_s3 = inlined_call_operand.vmem [shape: f32[2,1,8], index: 3, kind: input, shape index: {}]   ;;  %s2328_s7 = inlined_call_operand.vmem [shape: bf16[32,32], index: 7, kind: input, shape index: {}]   ;;  %s2329_s8 = inlined_call_operand.vmem [shape: f32[1,32], index: 8, kind: input, shape index: {}]   ;;  %s2330_s2 = inlined_call_operand.vmem [shape: f32[2,8,1], index: 2, kind: input, shape index: {}]   ;;  %s2331_s11 = inlined_call_operand.vmem [shape: bf16[32,64], index: 11, kind: input, shape index: {}]   ;;  %s2332_s9 = inlined_call_operand.vmem [shape: f32[1,32], index: 9, kind: input, shape index: {}]   ;;  %s2333_s10 = inlined_call_operand.vmem [shape: f32[1,32], index: 10, kind: input, shape index: {}]   ;;  %s2334_s13 = inlined_call_operand.vmem [shape: bf16[64,32], index: 13, kind: input, shape index: {}]   ;;  %s2335_s12 = inlined_call_operand.vmem [shape: f32[1,64], index: 12, kind: input, shape index: {}]   ;;  %s2336_s14 = inlined_call_operand.vmem [shape: f32[1,32], index: 14, kind: input, shape index: {}]   ;;  %s2337_s15 = inlined_call_operand.vmem [shape: f32[1,32], index: 15, kind: input, shape index: {}]   ;;  %s2338_s16 = inlined_call_operand.vmem [shape: f32[1,32], index: 16, kind: input, shape index: {}]   ;;  %s2339_s17 = inlined_call_operand.vmem [shape: f32[2,8,32], index: 17, kind: output, shape index: {}]  }
   0x1   :  { %2342 = sst [smem:[#allocation2_spill]] %s2322_s4  ;;  %1657 = vmatprep.subr.bf16.mxu0 %v1889_v0  ;;  %1665 = vmatprep.subr.bf16.mxu1 %v1889_v0  ;;  %v57_v5 = vld [vmem:[%s2324_s0] sm:$0xff]  ;;  %v58_v6 = vld [vmem:[%s2324_s0 + $0x8] sm:$0xff]  ;;  %s1893_s4 = smov 104   ;;  %v1894_v32 = vmov 0   ;;  %vm800_vm3 = vcmask 1043456   ;;  %v664_v55 = vlaneseq }
   0x2   :  { %2343 = sst [smem:[#allocation3_spill]] %s2323_s5  ;;  %s2344_s26 = sld [smem:[#allocation2_spill]]  ;;  %1661 = vmatprep.mubr.msk.bf16.mxu0 %vm1890_vm0, %v1889_v0  ;;  %1669 = vmatprep.mubr.msk.bf16.mxu1 %vm1890_vm0, %v1889_v0  ;;  %v59_v7 = vld [vmem:[%s2325_s1] sm:$0xff]  ;;  %v60_v8 = vld [vmem:[%s2325_s1 + $0x8] sm:$0xff]  ;;  %vm1192_vm11 = vcmask 130048   ;;  %vm1195_vm12 = vcmask 195584  }
   0x3   :  { %s2345_s29 = sld [smem:[#allocation3_spill]]  ;;  %v2020_v9 = vadd.f32 %v59_v7, %v57_v5  ;;  %v2022_v10 = vadd.f32 %v60_v8, %v58_v6  ;;  %v1835_v11 = vld [vmem:[%s2326_s6] sm:$0xff]   ;;  %v1836_v13 = vld [vmem:[%s2326_s6 + $0x8] sm:$0xff]   ;;  %s1891_s6 = smov 120   ;;  %1829 = vset.pattern.permute.xlu0 %v1894_v32  ;;  %1830 = vset.pattern.permute.xlu1 %v1894_v32  ;;  %v665_v57 = vshrl.u32 %v664_v55, 7  ;;  %v667_v62 = vand.u32 127, %v664_v55 }
   0x4   :  { %v669_v56 = vld [vmem:[%s2327_s3] sm:$0x1]  ;;  %v670_v58 = vld [vmem:[%s2327_s3 + $0x1] sm:$0x1]  ;;  %s1895_s3 = smov 8   ;;  %vm1451_vm13 = vcmask 523264  }
   0x5   :  { %v65_v12 = vpack.c.bf16 %v2022_v10, %v2020_v9  ;;  %vm671_vm4 = vcmp.eq.f32.partialorder %v669_v56, 0.0  ;;  %v679_v59 = vsub.s32 0, %v665_v57  ;;  %vm672_vm5 = vcmp.eq.f32.partialorder %v670_v58, 0.0 }
   0x6   :  { %v675_v60 = vsel %vm671_vm4, 1, %v1894_v32  ;;  %v676_v61 = vsel %vm672_vm5, 1, %v1894_v32  ;;  %vm668_vm6 = vcmp.gt.s32.totalorder %v667_v62, %v665_v57 }
   0x7   :  { %v680_v63 = vrot.slane %v675_v60, %v679_v59 }
   0x8   :  { %v1831_v1 = vld [vmem:[%s2344_s26] sm:$0xff]   ;;  %v1833_v3 = vld [vmem:[%s2344_s26 + $0x8] sm:$0xff]  }
   0x9   :  { %v1832_v2 = vld [vmem:[%s2345_s29] sm:$0xff]   ;;  %1658 = vmatpush3.bf16.msra.mxu0 %v1831_v1  ;;  %v1834_v4 = vld [vmem:[%s2345_s29 + $0x8] sm:$0xff]   ;;  %s1892_s29 = smov 112   ;;  %v684_v1 = vrot.slane %v676_v61, %v679_v59  ;;  %vm685_vm7 = vcmp.eq.s32.totalorder %v680_v63, 1 }
   0xa   :  { %1666 = vmatpush3.bf16.msra.mxu1 %v1832_v2  ;;  %1659 = vmatprep.subr.bf16.mxu0 %v1889_v0  ;;  %vm2117_vm9 = vmor %vm668_vm6, %vm685_vm7 }
   0xb   :  { %1667 = vmatprep.subr.bf16.mxu1 %v1889_v0  ;;  %vm686_vm8 = vcmp.eq.s32.totalorder %v684_v1, 1 }
   0xc   :  { %vm2121_vm10 = vmor %vm668_vm6, %vm686_vm8 }
   0xd   :  { %1660 = vmatpush3.bf16.msra.mxu0 %v1833_v3 }
   0xe   :  { %1668 = vmatpush3.bf16.msra.mxu1 %v1834_v4  ;;  %1673 = vmatprep.subr.bf16.mxu0 %v1889_v0 }
   0xf   :  { %1681 = vmatprep.subr.bf16.mxu1 %v1889_v0 }
  0x10   :  { %1662 = vmatmul.mubr.msk.bf16.vlgmr.msra.gmra.mrb[0].mxu0 %vm82_vm1, %v65_v12 }
  0x11   :  { %1670 = vmatmul.mubr.msk.bf16.vlgmr.msra.gmra.mrb[0].mxu1 %vm82_vm1, %v65_v12  ;;  %1674 = vmatpush3.bf16.msra.mxu0 %v1835_v11 }
  0x12   :  { %1677 = vmatprep.mubr.msk.bf16.mxu0 %vm1890_vm0, %v1889_v0  ;;  %1675 = vmatprep.subr.bf16.mxu0 %v1889_v0 }
  0x13   :  { %1683 = vmatprep.mubr.msk.bf16.mxu1 %vm1890_vm0, %v1889_v0 }
  0x15   :  { %1676 = vmatpush3.bf16.msra.mxu0 %v1836_v13 }
  0x16   :  { %1687 = vmatprep.subr.bf16.mxu0 %v1889_v0 }
  0x18   :  { %1678 = vmatmul.mubr.msk.bf16.vlgmr.msra.gmra.mrb[4].mxu0 %vm82_vm1, %v65_v12 }
  0x19   :  { %1689 = vmatprep.mubr.msk.bf16.mxu0 %vm1890_vm0, %v1889_v0 }
  0xe3   :  { %v120_v14 = vpop.f32.mrb[0].mxu0 }
  0xe4   :  { %v177_v15 = vpop.f32.mrb[0].mxu1  ;;  %v1599_v16 = vpack.c.bf16 %v120_v14, %v120_v14  ;;  %v1663_v19 = vpop.f32.mrb[1].mxu0 }
  0xe5   :  { %v1601_v17 = vpack.c.bf16 %v177_v15, %v177_v15  ;;  %v1671_v18 = vpop.f32.mrb[1].mxu1  ;;  %v123_v21 = vpop.f32.mrb[2].mxu0 }
  0xe6   :  { %v180_v20 = vpop.f32.mrb[2].mxu1  ;;  %247 = vrot.lane.b32.xlu1 %v1599_v16, %s1891_s6  ;;  %v1600_v24 = vpack.c.bf16 %v123_v21, %v123_v21  ;;  %v1664_v26 = vpop.f32.mrb[3].mxu0 }
  0xe7   :  { %v1602_v22 = vpack.c.bf16 %v180_v20, %v180_v20  ;;  %265 = vrot.lane.b32.xlu0 %v1601_v17, %s1891_s6  ;;  %v1672_v23 = vpop.f32.mrb[3].mxu1  ;;  %v300_v25 = vsel %vm295_vm2, %v1601_v17, 0 }
  0xe8   :  { %1682 = vmatpush3.bf16.xpose.msra.mxu1 %v300_v25 }
  0xe9   :  { %v346_v27 = vsel %vm295_vm2, %v1602_v22, 0  ;;  %1693 = vmatprep.subr.bf16.mxu1 %v1889_v0 }
  0xea   :  { %1688 = vmatpush3.bf16.xpose.msra.mxu0 %v346_v27  ;;  %249 = vrot.lane.b32.xlu1 %v1600_v24, %s1891_s6 }
  0xeb   :  { %267 = vrot.lane.b32.xlu0 %v1602_v22, %s1891_s6  ;;  %1699 = vmatprep.subr.bf16.mxu0 %v1889_v0  ;;  %v234_v28 = vpop.f32.mrb[4].mxu0 }
  0xec   :  { %v1679_v29 = vpop.f32.mrb[5].mxu0  ;;  %v2087_v48 = vpack.c.bf16 %v234_v28, %v234_v28 }
  0xed   :  { %v237_v30 = vpop.f32.mrb[6].mxu0 }
  0xee   :  { %271 = vrot.lane.b32.xlu1 %v1602_v22, %s1892_s29  ;;  %v1680_v31 = vpop.f32.mrb[7].mxu0  ;;  %v2094_v50 = vpack.c.bf16 %v237_v30, %v237_v30  ;;  %v802_v51 = vsel %vm800_vm3, %v2087_v48, 0 }
  0xef   :  { %269 = vrot.lane.b32.xlu0 %v1601_v17, %s1892_s29  ;;  %1684 = vmatmul.mubr.msk.bf16.vlgmr.msra.gmra.mrb[4].mxu1 %vm295_vm2, %v1599_v16 }
  0xf0   :  { %1695 = vmatprep.mubr.msk.bf16.mxu1 %vm1890_vm0, %v1889_v0  ;;  %v848_v53 = vsel %vm800_vm3, %v2094_v50, 0 }
  0xf1   :  { %1690 = vmatmul.mubr.msk.bf16.vlgmr.msra.gmra.mrb[8].mxu0 %vm295_vm2, %v1600_v24 }
  0xf2   :  { %1701 = vmatprep.mubr.msk.bf16.mxu0 %vm1890_vm0, %v1889_v0  ;;  %253 = vrot.lane.b32.xlu1 %v1600_v24, %s1892_s29 }
  0xf3   :  { %251 = vrot.lane.b32.xlu0 %v1599_v16, %s1892_s29 }
  0xf6   :  { %275 = vrot.lane.b32.xlu1 %v1602_v22, %s1893_s4 }
  0xf7   :  { %273 = vrot.lane.b32.xlu0 %v1601_v17, %s1893_s4 }
  0xfa   :  { %257 = vrot.lane.b32.xlu1 %v1600_v24, %s1893_s4 }
  0xfb   :  { %255 = vrot.lane.b32.xlu0 %v1599_v16, %s1893_s4 }
 0x158   :  { %v248_v34 = vpop.permute.xlu1 %247 }
 0x159   :  { %v266_v33 = vpop.permute.xlu0 %265 }
 0x15a   :  { %v392_v35 = vsel %vm295_vm2, %v266_v33, 0 }
 0x15b   :  { %1694 = vmatpush3.bf16.xpose.msra.mxu1 %v392_v35 }
 0x15c   :  { %1705 = vmatprep.subr.bf16.mxu1 %v1889_v0  ;;  %v250_v37 = vpop.permute.xlu1 %249 }
 0x15d   :  { %v268_v36 = vpop.permute.xlu0 %267 }
 0x15e   :  { %v438_v38 = vsel %vm295_vm2, %v268_v36, 0 }
 0x15f   :  { %1700 = vmatpush3.bf16.xpose.msra.mxu0 %v438_v38 }
 0x160   :  { %1711 = vmatprep.subr.bf16.mxu0 %v1889_v0  ;;  %v272_v41 = vpop.permute.xlu1 %271 }
 0x161   :  { %v270_v39 = vpop.permute.xlu0 %269  ;;  %v530_v43 = vsel %vm295_vm2, %v272_v41, 0 }
 0x162   :  { %v484_v40 = vsel %vm295_vm2, %v270_v39, 0  ;;  %1696 = vmatmul.mubr.msk.bf16.vlgmr.msra.gmra.mrb[8].mxu1 %vm295_vm2, %v248_v34 }
 0x163   :  { %1706 = vmatpush3.bf16.xpose.msra.mxu1 %v484_v40  ;;  %1707 = vmatprep.mubr.msk.bf16.mxu1 %vm1890_vm0, %v1889_v0 }
 0x164   :  { %1717 = vmatprep.subr.bf16.mxu1 %v1889_v0  ;;  %v254_v44 = vpop.permute.xlu1 %253 }
 0x165   :  { %v252_v42 = vpop.permute.xlu0 %251 }
 0x166   :  { %1702 = vmatmul.mubr.msk.bf16.vlgmr.msra.gmra.mrb[12].mxu0 %vm295_vm2, %v250_v37 }
 0x167   :  { %1712 = vmatpush3.bf16.xpose.msra.mxu0 %v530_v43  ;;  %1713 = vmatprep.mubr.msk.bf16.mxu0 %vm1890_vm0, %v1889_v0 }
 0x168   :  { %1723 = vmatprep.subr.bf16.mxu0 %v1889_v0  ;;  %v276_v47 = vpop.permute.xlu1 %275 }
 0x169   :  { %v274_v45 = vpop.permute.xlu0 %273  ;;  %v622_v49 = vsel %vm295_vm2, %v276_v47, 0 }
 0x16a   :  { %v576_v46 = vsel %vm295_vm2, %v274_v45, 0  ;;  %1708 = vmatmul.mubr.msk.bf16.vlgmr.msra.gmra.mrb[12].mxu1 %vm295_vm2, %v252_v42 }
 0x16b   :  { %1718 = vmatpush3.bf16.xpose.msra.mxu1 %v576_v46  ;;  %1719 = vmatprep.mubr.msk.bf16.mxu1 %vm1890_vm0, %v1889_v0 }
 0x16c   :  { %1729 = vmatprep.subr.bf16.mxu1 %v1889_v0  ;;  %v258_v54 = vpop.permute.xlu1 %257 }
 0x16d   :  { %v256_v52 = vpop.permute.xlu0 %255 }
 0x16e   :  { %1714 = vmatmul.mubr.msk.bf16.vlgmr.msra.gmra.mrb[16].mxu0 %vm295_vm2, %v254_v44 }
 0x16f   :  { %1724 = vmatpush3.bf16.xpose.msra.mxu0 %v622_v49  ;;  %1725 = vmatprep.mubr.msk.bf16.mxu0 %vm1890_vm0, %v1889_v0 }
 0x170   :  { %1735 = vmatprep.subr.bf16.mxu0 %v1889_v0 }
 0x172   :  { %1720 = vmatmul.mubr.msk.bf16.vlgmr.msra.gmra.mrb[16].mxu1 %vm295_vm2, %v256_v52 }
 0x173   :  { %1730 = vmatpush3.bf16.msra.mxu1 %v802_v51  ;;  %1731 = vmatprep.mubr.msk.bf16.mxu1 %vm1890_vm0, %v1889_v0 }
 0x174   :  { %1741 = vmatprep.subr.bf16.mxu1 %v1889_v0 }
 0x176   :  { %1726 = vmatmul.mubr.msk.bf16.vlgmr.msra.gmra.mrb[20].mxu0 %vm295_vm2, %v258_v54 }
 0x177   :  { %1736 = vmatpush3.bf16.msra.mxu0 %v848_v53  ;;  %1737 = vmatprep.mubr.msk.bf16.mxu0 %vm1890_vm0, %v1889_v0 }
 0x178   :  { %1747 = vmatprep.subr.bf16.mxu0 %v1889_v0 }
 0x1c2   :  { %v336_v3 = vpop.f32.mrb[4].mxu1 }
 0x1c3   :  { %v2127_v5 = vsel %vm2117_vm9, -1e+09, %v336_v3  ;;  %v1685_v6 = vpop.f32.mrb[5].mxu1 }
 0x1c4   :  { %v339_v7 = vpop.f32.mrb[6].mxu1  ;;  %v382_v8 = vpop.f32.mrb[8].mxu0  ;;  %v701_v11 = vsel %vm295_vm2, %v2127_v5, -inf }
 0x1c5   :  { %v694_v12 = vsel %vm2121_vm10, -1e+09, %v382_v8  ;;  %702 = vmax.xlane.f32.xlu0 %v701_v11  ;;  %v1686_v13 = vpop.f32.mrb[7].mxu1  ;;  %v1691_v14 = vpop.f32.mrb[9].mxu0 }
 0x1c6   :  { %v385_v15 = vpop.f32.mrb[10].mxu0  ;;  %v704_v16 = vsel %vm295_vm2, %v694_v12, -inf }
 0x1c7   :  { %705 = vmax.xlane.f32.xlu1 %v704_v16  ;;  %v1692_v17 = vpop.f32.mrb[11].mxu0 }
 0x235   :  { %v428_v18 = vpop.f32.mrb[8].mxu1 }
 0x236   :  { %v695_v19 = vsel %vm2117_vm9, -1e+09, %v428_v18  ;;  %v1697_v20 = vpop.f32.mrb[9].mxu1 }
 0x237   :  { %v431_v21 = vpop.f32.mrb[10].mxu1  ;;  %v707_v22 = vsel %vm295_vm2, %v695_v19, -inf }
 0x238   :  { %708 = vmax.xlane.f32.xlu0 %v707_v22  ;;  %v1698_v23 = vpop.f32.mrb[11].mxu1 }
 0x239   :  { %v474_v24 = vpop.f32.mrb[12].mxu0 }
 0x23a   :  { %v696_v25 = vsel %vm2121_vm10, -1e+09, %v474_v24  ;;  %v1703_v26 = vpop.f32.mrb[13].mxu0 }
 0x23b   :  { %v477_v27 = vpop.f32.mrb[14].mxu0  ;;  %v710_v28 = vsel %vm295_vm2, %v696_v25, -inf }
 0x23c   :  { %711 = vmax.xlane.f32.xlu0 %v710_v28  ;;  %v1704_v29 = vpop.f32.mrb[15].mxu0 }
 0x23d   :  { %v520_v30 = vpop.f32.mrb[12].mxu1 }
 0x23e   :  { %v2142_v31 = vsel %vm2117_vm9, -1e+09, %v520_v30  ;;  %v1709_v32 = vpop.f32.mrb[13].mxu1 }
 0x23f   :  { %v523_v33 = vpop.f32.mrb[14].mxu1  ;;  %v713_v34 = vsel %vm295_vm2, %v2142_v31, -inf }
 0x240   :  { %v1710_v35 = vpop.f32.mrb[15].mxu1  ;;  %714 = vmax.xlane.f32.xlu1 %v713_v34 }
 0x241   :  { %v566_v36 = vpop.f32.mrb[16].mxu0 }
 0x242   :  { %v2148_v37 = vsel %vm2121_vm10, -1e+09, %v566_v36  ;;  %v1715_v38 = vpop.f32.mrb[17].mxu0 }
 0x243   :  { %v569_v39 = vpop.f32.mrb[18].mxu0  ;;  %v716_v40 = vsel %vm295_vm2, %v2148_v37, -inf }
 0x244   :  { %717 = vmax.xlane.f32.xlu0 %v716_v40  ;;  %v1716_v41 = vpop.f32.mrb[19].mxu0 }
 0x245   :  { %v612_v42 = vpop.f32.mrb[16].mxu1 }
 0x246   :  { %v699_v43 = vsel %vm2117_vm9, -1e+09, %v612_v42  ;;  %v1721_v44 = vpop.f32.mrb[17].mxu1 }
 0x247   :  { %v615_v45 = vpop.f32.mrb[18].mxu1  ;;  %v719_v46 = vsel %vm295_vm2, %v699_v43, -inf }
 0x248   :  { %v1722_v47 = vpop.f32.mrb[19].mxu1  ;;  %720 = vmax.xlane.f32.xlu1 %v719_v46 }
 0x249   :  { %v658_v49 = vpop.f32.mrb[20].mxu0 }
 0x24a   :  { %v700_v51 = vsel %vm2121_vm10, -1e+09, %v658_v49  ;;  %v1727_v52 = vpop.f32.mrb[21].mxu0 }
 0x24b   :  { %v661_v53 = vpop.f32.mrb[22].mxu0  ;;  %v722_v54 = vsel %vm295_vm2, %v700_v51, -inf }
 0x24c   :  { %723 = vmax.xlane.f32.xlu0 %v722_v54  ;;  %v1728_v55 = vpop.f32.mrb[23].mxu0 }
 0x252   :  { %v703_v60 = vpop.xlane.xlu0 %702 }
 0x253   :  { %v725_v62 = vsub.f32 %v2127_v5, %v703_v60 }
 0x254   :  { %v706_v56 = vpop.xlane.xlu1 %705 }
 0x255   :  { %v726_v57 = vsub.f32 %v694_v12, %v706_v56  ;;  %v733_v63 = vmul.f32 1.442695, %v725_v62 }
 0x257   :  { %v735_v58 = vmul.f32 1.442695, %v726_v57 }
 0x259   :  { %1845 = vpow2.f32 %v735_v58  ;;  %283 = vrot.lane.b32.xlu1 %v2087_v48, %s1891_s6 }
 0x25a   :  { %1847 = vpow2.f32 %v733_v63 }
 0x263   :  { %v1846_v59 = vpop.eup %1845 }
 0x264   :  { %v752_v61 = vsel %vm295_vm2, %v1846_v59, 0.0  ;;  %v1848_v1 = vpop.eup %1847 }
 0x265   :  { %753 = vadd.xlane.f32.xlu0 %v752_v61  ;;  %v749_v2 = vsel %vm295_vm2, %v1848_v1, 0.0 }
 0x27d   :  { %750 = vadd.xlane.f32.xlu1 %v749_v2 }
 0x2c5   :  { %v709_v3 = vpop.xlane.xlu0 %708 }
 0x2c6   :  { %v727_v4 = vsub.f32 %v695_v19, %v709_v3 }
 0x2c8   :  { %v737_v6 = vmul.f32 1.442695, %v727_v4 }
 0x2c9   :  { %v712_v7 = vpop.xlane.xlu0 %711 }
 0x2ca   :  { %1849 = vpow2.f32 %v737_v6  ;;  %v728_v8 = vsub.f32 %v696_v25, %v712_v7 }
 0x2cc   :  { %v739_v11 = vmul.f32 1.442695, %v728_v8 }
 0x2cd   :  { %v715_v18 = vpop.xlane.xlu1 %714 }
 0x2ce   :  { %1851 = vpow2.f32 %v739_v11  ;;  %v729_v19 = vsub.f32 %v2142_v31, %v715_v18 }
 0x2d0   :  { %v741_v22 = vmul.f32 1.442695, %v729_v19 }
 0x2d1   :  { %v718_v15 = vpop.xlane.xlu0 %717 }
 0x2d2   :  { %v730_v20 = vsub.f32 %v2148_v37, %v718_v15 }
 0x2d4   :  { %v2163_v12 = vpop.eup %1849  ;;  %v743_v25 = vmul.f32 1.442695, %v730_v20 }
 0x2d5   :  { %v755_v13 = vsel %vm295_vm2, %v2163_v12, 0.0  ;;  %v721_v21 = vpop.xlane.xlu1 %720 }
 0x2d6   :  { %756 = vadd.xlane.f32.xlu1 %v755_v13  ;;  %v731_v23 = vsub.f32 %v699_v43, %v721_v21 }
 0x2d8   :  { %v2167_v5 = vpop.eup %1851  ;;  %v745_v28 = vmul.f32 1.442695, %v731_v23 }
 0x2d9   :  { %v758_v14 = vsel %vm295_vm2, %v2167_v5, 0.0  ;;  %v724_v16 = vpop.xlane.xlu0 %723  ;;  %v284_v31 = vpop.permute.xlu1 %283 }
 0x2da   :  { %759 = vadd.xlane.f32.xlu0 %v758_v14  ;;  %v732_v26 = vsub.f32 %v700_v51, %v724_v16  ;;  %v894_v44 = vsel %vm800_vm3, %v284_v31, 0 }
 0x2dc   :  { %v747_v30 = vmul.f32 1.442695, %v732_v26 }
 0x2e7   :  { %287 = vrot.lane.b32.xlu1 %v2087_v48, %s1892_s29 }
 0x2eb   :  { %289 = vrot.lane.b32.xlu1 %v2094_v50, %s1892_s29 }
 0x2f0   :  { %285 = vrot.lane.b32.xlu0 %v2094_v50, %s1891_s6 }
 0x2f2   :  { %v754_v17 = vpop.xlane.xlu0 %753 }
 0x2f3   :  { %1853 = vrcp.f32 %v754_v17 }
 0x2f4   :  { %1855 = vpow2.f32 %v741_v22 }
 0x2f5   :  { %1857 = vpow2.f32 %v743_v25 }
 0x2f6   :  { %1859 = vpow2.f32 %v745_v28 }
 0x2f7   :  { %1861 = vpow2.f32 %v747_v30 }
 0x2fd   :  { %v1854_v24 = vpop.eup %1853 }
 0x2fe   :  { %v782_v27 = vmul.f32 %v1854_v24, %v1846_v59  ;;  %v1856_v32 = vpop.eup %1855 }
 0x2ff   :  { %v1858_v34 = vpop.eup %1857  ;;  %v761_v36 = vsel %vm295_vm2, %v1856_v32, 0.0 }
 0x300   :  { %v790_v29 = vpack.c.bf16 %v782_v27, %v782_v27  ;;  %v2182_v35 = vpop.eup %1859  ;;  %v764_v37 = vsel %vm295_vm2, %v1858_v34, 0.0 }
 0x301   :  { %v2186_v38 = vpop.eup %1861  ;;  %v767_v39 = vsel %vm295_vm2, %v2182_v35, 0.0 }
 0x302   :  { %1738 = vmatmul.mubr.msk.bf16.vlgmr.msra.gmra.mrb[24].mxu0 %vm295_vm2, %v790_v29  ;;  %v770_v40 = vsel %vm295_vm2, %v2186_v38, 0.0 }
 0x303   :  { %1749 = vmatprep.mubr.msk.bf16.mxu0 %vm1890_vm0, %v1889_v0 }
 0x30a   :  { %v751_v33 = vpop.xlane.xlu1 %750 }
 0x30b   :  { %1863 = vrcp.f32 %v751_v33 }
 0x30f   :  { %762 = vadd.xlane.f32.xlu1 %v761_v36  ;;  %765 = vadd.xlane.f32.xlu0 %v764_v37  ;;  %v1838_v37 = vld [vmem:[%s2328_s7 + $0x8] sm:$0xff]  }
 0x313   :  { %768 = vadd.xlane.f32.xlu1 %v767_v39  ;;  %771 = vadd.xlane.f32.xlu0 %v770_v40 }
 0x315   :  { %v1864_v41 = vpop.eup %1863 }
 0x316   :  { %v781_v42 = vmul.f32 %v1864_v41, %v1848_v1 }
 0x318   :  { %v789_v43 = vpack.c.bf16 %v781_v42, %v781_v42 }
 0x31a   :  { %1732 = vmatmul.mubr.msk.bf16.vlgmr.msra.gmra.mrb[20].mxu1 %vm295_vm2, %v789_v43 }
 0x31b   :  { %1742 = vmatpush3.bf16.msra.mxu1 %v894_v44  ;;  %1743 = vmatprep.mubr.msk.bf16.mxu1 %vm1890_vm0, %v1889_v0 }
 0x31c   :  { %1753 = vmatprep.subr.bf16.mxu1 %v1889_v0 }
 0x324   :  { %293 = vrot.lane.b32.xlu1 %v2094_v50, %s1893_s4 }
 0x329   :  { %291 = vrot.lane.b32.xlu0 %v2087_v48, %s1893_s4 }
 0x363   :  { %v757_v45 = vpop.xlane.xlu1 %756 }
 0x364   :  { %1865 = vrcp.f32 %v757_v45 }
 0x367   :  { %v760_v46 = vpop.xlane.xlu0 %759  ;;  %v288_v52 = vpop.permute.xlu1 %287 }
 0x368   :  { %1867 = vrcp.f32 %v760_v46  ;;  %v986_v50 = vsel %vm800_vm3, %v288_v52, 0 }
 0x36b   :  { %v286_v47 = vpop.permute.xlu0 %285  ;;  %v290_v56 = vpop.permute.xlu1 %289 }
 0x36c   :  { %v940_v49 = vsel %vm800_vm3, %v286_v47, 0  ;;  %v1032_v58 = vsel %vm800_vm3, %v290_v56, 0 }
 0x36d   :  { %1748 = vmatpush3.bf16.msra.mxu0 %v940_v49 }
 0x36e   :  { %v1866_v51 = vpop.eup %1865  ;;  %1759 = vmatprep.subr.bf16.mxu0 %v1889_v0 }
 0x36f   :  { %v783_v53 = vmul.f32 %v1866_v51, %v2163_v12 }
 0x371   :  { %v791_v54 = vpack.c.bf16 %v783_v53, %v783_v53 }
 0x372   :  { %v1868_v55 = vpop.eup %1867 }
 0x373   :  { %v784_v48 = vmul.f32 %v1868_v55, %v2167_v5  ;;  %1744 = vmatmul.mubr.msk.bf16.vlgmr.msra.gmra.mrb[24].mxu1 %vm295_vm2, %v791_v54 }
 0x374   :  { %1754 = vmatpush3.bf16.msra.mxu1 %v986_v50  ;;  %1755 = vmatprep.mubr.msk.bf16.mxu1 %vm1890_vm0, %v1889_v0 }
 0x375   :  { %v792_v57 = vpack.c.bf16 %v784_v48, %v784_v48  ;;  %1765 = vmatprep.subr.bf16.mxu1 %v1889_v0 }
 0x377   :  { %1750 = vmatmul.mubr.msk.bf16.vlgmr.msra.gmra.mrb[28].mxu0 %vm295_vm2, %v792_v57 }
 0x378   :  { %1760 = vmatpush3.bf16.msra.mxu0 %v1032_v58  ;;  %1761 = vmatprep.mubr.msk.bf16.mxu0 %vm1890_vm0, %v1889_v0 }
 0x379   :  { %1771 = vmatprep.subr.bf16.mxu0 %v1889_v0 }
 0x39c   :  { %v763_v59 = vpop.xlane.xlu1 %762  ;;  %v766_v60 = vpop.xlane.xlu0 %765 }
 0x39d   :  { %1869 = vrcp.f32 %v763_v59 }
 0x39e   :  { %1871 = vrcp.f32 %v766_v60 }
 0x3a0   :  { %v769_v61 = vpop.xlane.xlu1 %768  ;;  %v772_v62 = vpop.xlane.xlu0 %771 }
 0x3a1   :  { %1873 = vrcp.f32 %v769_v61 }
 0x3a2   :  { %1875 = vrcp.f32 %v772_v62 }
 0x3a4   :  { %v292_v4 = vpop.permute.xlu0 %291  ;;  %v294_v6 = vpop.permute.xlu1 %293 }
 0x3a5   :  { %v1078_v13 = vsel %vm800_vm3, %v292_v4, 0  ;;  %v1124_v5 = vsel %vm800_vm3, %v294_v6, 0 }
 0x3a7   :  { %v1870_v63 = vpop.eup %1869 }
 0x3a8   :  { %v1872_v1 = vpop.eup %1871  ;;  %v785_v2 = vmul.f32 %v1870_v63, %v1856_v32 }
 0x3a9   :  { %v786_v3 = vmul.f32 %v1872_v1, %v1858_v34 }
 0x3aa   :  { %v793_v7 = vpack.c.bf16 %v785_v2, %v785_v2 }
 0x3ab   :  { %v1874_v8 = vpop.eup %1873  ;;  %v794_v11 = vpack.c.bf16 %v786_v3, %v786_v3 }
 0x3ac   :  { %v1876_v12 = vpop.eup %1875  ;;  %1756 = vmatmul.mubr.msk.bf16.vlgmr.msra.gmra.mrb[28].mxu1 %vm295_vm2, %v793_v7  ;;  %v787_v14 = vmul.f32 %v1874_v8, %v2182_v35  ;;  %v1837_v35 = vld [vmem:[%s2328_s7] sm:$0xff]   ;;  %s1897_s7 = smov 24  }
 0x3ad   :  { %1762 = vmatmul.mubr.msk.bf16.vlgmr.msra.gmra.mrb[32].mxu0 %vm295_vm2, %v794_v11  ;;  %1766 = vmatpush3.bf16.msra.mxu1 %v1078_v13  ;;  %v788_v15 = vmul.f32 %v1876_v12, %v2186_v38  ;;  %v1581_v11 = vld [vmem:[%s2329_s8] ss:$0 sm:$0xff] }
 0x3ae   :  { %1772 = vmatpush3.bf16.msra.mxu0 %v1124_v5  ;;  %1767 = vmatprep.mubr.msk.bf16.mxu1 %vm1890_vm0, %v1889_v0  ;;  %v795_v16 = vpack.c.bf16 %v787_v14, %v787_v14 }
 0x3af   :  { %1773 = vmatprep.mubr.msk.bf16.mxu0 %vm1890_vm0, %v1889_v0  ;;  %1777 = vmatprep.subr.bf16.mxu1 %v1889_v0  ;;  %v796_v17 = vpack.c.bf16 %v788_v15, %v788_v15 }
 0x3b0   :  { %1785 = vmatprep.subr.bf16.mxu0 %v1889_v0 }
 0x3b4   :  { %1768 = vmatmul.mubr.msk.bf16.vlgmr.msra.gmra.mrb[32].mxu1 %vm295_vm2, %v795_v16 }
 0x3b5   :  { %1774 = vmatmul.mubr.msk.bf16.vlgmr.msra.gmra.mrb[36].mxu0 %vm295_vm2, %v796_v17  ;;  %1781 = vmatprep.mubr.msk.bf16.mxu1 %vm1890_vm0, %v1889_v0 }
 0x3b6   :  { %1789 = vmatprep.mubr.msk.bf16.mxu0 %vm1890_vm0, %v1889_v0  ;;  %1778 = vmatpush3.bf16.msra.mxu1 %v1837_v35 }
 0x3b7   :  { %1779 = vmatprep.subr.bf16.mxu1 %v1889_v0 }
 0x3ba   :  { %1780 = vmatpush3.bf16.msra.mxu1 %v1838_v37 }
 0x3bb   :  { %1793 = vmatprep.subr.bf16.mxu1 %v1889_v0 }
 0x3d5   :  { %v884_v18 = vpop.f32.mrb[24].mxu0 }
 0x3d6   :  { %v1739_v19 = vpop.f32.mrb[25].mxu0 }
 0x3d7   :  { %v887_v20 = vpop.f32.mrb[26].mxu0 }
 0x3d8   :  { %v1740_v21 = vpop.f32.mrb[27].mxu0 }
 0x3ed   :  { %v838_v22 = vpop.f32.mrb[20].mxu1 }
 0x3ee   :  { %v1733_v23 = vpop.f32.mrb[21].mxu1 }
 0x3ef   :  { %v841_v24 = vpop.f32.mrb[22].mxu1 }
 0x3f0   :  { %v1734_v25 = vpop.f32.mrb[23].mxu1 }
 0x446   :  { %v930_v26 = vpop.f32.mrb[24].mxu1 }
 0x447   :  { %v1745_v27 = vpop.f32.mrb[25].mxu1 }
 0x448   :  { %v933_v28 = vpop.f32.mrb[26].mxu1 }
 0x449   :  { %v1746_v29 = vpop.f32.mrb[27].mxu1 }
 0x44a   :  { %v976_v30 = vpop.f32.mrb[28].mxu0 }
 0x44b   :  { %v1814_v31 = vpack.i.bf16 %v976_v30, %v930_v26  ;;  %v1751_v32 = vpop.f32.mrb[29].mxu0  ;;  %v63_v30 = vld [vmem:[%s2330_s2] sm:$0xff] }
 0x44c   :  { %v979_v33 = vpop.f32.mrb[30].mxu0  ;;  %v1840_v32 = vld [vmem:[%s2331_s11 + $0x8] sm:$0xff]  }
 0x44d   :  { %1815 = vrot.lane.b32.xlu0 %v1814_v31, %s1895_s3  ;;  %v1752_v34 = vpop.f32.mrb[31].mxu0  ;;  %v1839_v31 = vld [vmem:[%s2331_s11] sm:$0xff]  }
 0x44e   :  { %1786 = vmatpush3.bf16.msra.mxu0 %v1839_v31 }
 0x44f   :  { %1787 = vmatprep.subr.bf16.mxu0 %v1889_v0 }
 0x452   :  { %1788 = vmatpush3.bf16.msra.mxu0 %v1840_v32 }
 0x47f   :  { %v1022_v36 = vpop.f32.mrb[28].mxu1 }
 0x480   :  { %v1068_v38 = vpop.f32.mrb[32].mxu0  ;;  %v1757_v39 = vpop.f32.mrb[29].mxu1 }
 0x481   :  { %v1819_v40 = vpack.i.bf16 %v1068_v38, %v1022_v36  ;;  %v1763_v41 = vpop.f32.mrb[33].mxu0  ;;  %v1025_v42 = vpop.f32.mrb[30].mxu1 }
 0x482   :  { %v1071_v43 = vpop.f32.mrb[34].mxu0  ;;  %v1758_v44 = vpop.f32.mrb[31].mxu1 }
 0x483   :  { %1820 = vrot.lane.b32.xlu1 %v1819_v40, %s1896_s24  ;;  %v1764_v45 = vpop.f32.mrb[35].mxu0  ;;  %v1585_v40 = vld [vmem:[%s2332_s9] ss:$0 sm:$0xff] }
 0x484   :  { %v1586_v43 = vld [vmem:[%s2333_s10] ss:$0 sm:$0xff] }
 0x487   :  { %v1114_v46 = vpop.f32.mrb[32].mxu1 }
 0x488   :  { %v1160_v47 = vpop.f32.mrb[36].mxu0  ;;  %v1769_v49 = vpop.f32.mrb[33].mxu1 }
 0x489   :  { %v1824_v51 = vpack.i.bf16 %v1160_v47, %v1114_v46  ;;  %v1775_v52 = vpop.f32.mrb[37].mxu0  ;;  %v1117_v53 = vpop.f32.mrb[34].mxu1 }
 0x48a   :  { %v1163_v54 = vpop.f32.mrb[38].mxu0  ;;  %v1770_v55 = vpop.f32.mrb[35].mxu1 }
 0x48b   :  { %1825 = vrot.lane.b32.xlu0 %v1824_v51, %s1897_s7  ;;  %v1776_v50 = vpop.f32.mrb[39].mxu0 }
 0x48c   :  { %v1841_v50 = vld [vmem:[%s2334_s13] sm:$0xff]  }
 0x4bf   :  { %v1816_v48 = vpop.permute.xlu0 %1815 }
 0x4c0   :  { %v1818_v57 = vunpack.i.h.bf16 %v1816_v48  ;;  %v1817_v58 = vunpack.i.l.bf16 %v1816_v48  ;;  %v1842_v48 = vld [vmem:[%s2334_s13 + $0x8] sm:$0xff]  }
 0x4c2   :  { %v1191_v62 = vsel %vm295_vm2, %v884_v18, %v1818_v57  ;;  %v1190_v63 = vsel %vm295_vm2, %v838_v22, %v1817_v58  ;;  %v1844_v57 = vld [vmem:[%s2334_s13 + $0x18] sm:$0xff]   ;;  %v1587_v58 = vld [vmem:[%s2335_s12] ss:$0 sm:$0xff] }
 0x4f5   :  { %v1821_v56 = vpop.permute.xlu1 %1820 }
 0x4f6   :  { %v1823_v59 = vunpack.i.h.bf16 %v1821_v56  ;;  %v1822_v60 = vunpack.i.l.bf16 %v1821_v56  ;;  %v1843_v56 = vld [vmem:[%s2334_s13 + $0x10] sm:$0xff]  }
 0x4f8   :  { %v1194_v3 = vsel %vm1192_vm11, %v1191_v62, %v1823_v59  ;;  %v1193_v4 = vsel %vm1192_vm11, %v1190_v63, %v1822_v60 }
 0x4fd   :  { %v1826_v61 = vpop.permute.xlu0 %1825 }
 0x4fe   :  { %v1828_v1 = vunpack.i.h.bf16 %v1826_v61  ;;  %v1827_v2 = vunpack.i.l.bf16 %v1826_v61 }
 0x500   :  { %v1197_v6 = vsel %vm1195_vm12, %v1194_v3, %v1828_v1  ;;  %v1196_v7 = vsel %vm1195_vm12, %v1193_v4, %v1827_v2 }
 0x501   :  { %v1198_v8 = vpack.c.bf16 %v1197_v6, %v1196_v7 }
 0x503   :  { %1782 = vmatmul.mubr.msk.bf16.vlgmr.msra.gmra.mrb[36].mxu1 %vm82_vm1, %v1198_v8 }
 0x504   :  { %1801 = vmatprep.mubr.msk.bf16.mxu1 %vm1890_vm0, %v1889_v0  ;;  %1794 = vmatpush3.bf16.msra.mxu1 %v1841_v50 }
 0x505   :  { %1795 = vmatprep.subr.bf16.mxu1 %v1889_v0 }
 0x508   :  { %1796 = vmatpush3.bf16.msra.mxu1 %v1842_v48 }
 0x509   :  { %1797 = vmatprep.subr.bf16.mxu1 %v1889_v0 }
 0x50c   :  { %1798 = vmatpush3.bf16.msra.mxu1 %v1843_v56 }
 0x50d   :  { %1799 = vmatprep.subr.bf16.mxu1 %v1889_v0 }
 0x510   :  { %1800 = vmatpush3.bf16.msra.mxu1 %v1844_v57 }
 0x5d6   :  { %v1259_v12 = vpop.f32.mrb[36].mxu1 }
 0x5d7   :  { %v1260_v13 = vadd.f32 %v1581_v11, %v1259_v12  ;;  %v1783_v5 = vpop.f32.mrb[37].mxu1 }
 0x5d8   :  { %v1262_v14 = vpop.f32.mrb[38].mxu1 }
 0x5d9   :  { %v1263_v15 = vadd.f32 %v1581_v11, %v1262_v14  ;;  %v1784_v16 = vpop.f32.mrb[39].mxu1  ;;  %v1266_v17 = vadd.f32 %v1260_v13, %v2020_v9 }
 0x5db   :  { %v1270_v18 = vsel %vm82_vm1, %v1266_v17, 0.0  ;;  %v1267_v19 = vadd.f32 %v1263_v15, %v2022_v10  ;;  %v64_v10 = vld [vmem:[%s2330_s2 + $0x8] sm:$0xff] }
 0x5dc   :  { %1271 = vadd.xlane.f32.xlu1 %v1270_v18 }
 0x5dd   :  { %v1273_v20 = vsel %vm82_vm1, %v1267_v19, 0.0 }
 0x5de   :  { %1274 = vadd.xlane.f32.xlu0 %v1273_v20 }
 0x669   :  { %v1272_v21 = vpop.xlane.xlu1 %1271 }
 0x66a   :  { %v1277_v22 = vmul.f32 0.03125, %v1272_v21 }
 0x66b   :  { %v1275_v23 = vpop.xlane.xlu0 %1274 }
 0x66c   :  { %v1279_v24 = vsub.f32 %v1266_v17, %v1277_v22  ;;  %v1278_v25 = vmul.f32 0.03125, %v1275_v23  ;;  %v1591_v22 = vld [vmem:[%s2336_s14] ss:$0 sm:$0xff] }
 0x66e   :  { %v1280_v26 = vsub.f32 %v1267_v19, %v1278_v25  ;;  %v1281_v27 = vmul.f32 %v1279_v24, %v1279_v24 }
 0x670   :  { %v1283_v28 = vsel %vm82_vm1, %v1281_v27, 0.0  ;;  %v1282_v29 = vmul.f32 %v1280_v26, %v1280_v26 }
 0x671   :  { %1284 = vadd.xlane.f32.xlu0 %v1283_v28 }
 0x672   :  { %v1286_v9 = vsel %vm82_vm1, %v1282_v29, 0.0 }
 0x673   :  { %1287 = vadd.xlane.f32.xlu1 %v1286_v9 }
 0x684   :  { %1320 = vperm.xlu1 %1830, %v64_v10  }
 0x687   :  { %1315 = vperm.xlu0 %1829, %v63_v30  }
 0x6fe   :  { %v1285_v33 = vpop.xlane.xlu0 %1284 }
 0x6ff   :  { %v1289_v34 = vmul.f32 0.03125, %v1285_v33 }
 0x700   :  { %v1288_v35 = vpop.xlane.xlu1 %1287 }
 0x701   :  { %v1291_v36 = vadd.f32 1e-06, %v1289_v34  ;;  %v1290_v37 = vmul.f32 0.03125, %v1288_v35 }
 0x703   :  { %1877 = vrsqrt.f32 %v1291_v36  ;;  %v1292_v38 = vadd.f32 1e-06, %v1290_v37 }
 0x704   :  { %v2276_v51 = vpop.permute.xlu1 %1320 }
 0x705   :  { %1879 = vrsqrt.f32 %v1292_v38 }
 0x706   :  { %v2274_v49 = vpop.permute.xlu0 %1315 }
 0x70d   :  { %v1878_v39 = vpop.eup %1877 }
 0x70e   :  { %v1295_v41 = vmul.f32 %v1878_v39, %v1279_v24 }
 0x70f   :  { %v1880_v42 = vpop.eup %1879 }
 0x710   :  { %v1303_v44 = vmul.f32 %v1585_v40, %v1295_v41  ;;  %v1296_v45 = vmul.f32 %v1880_v42, %v1280_v26 }
 0x712   :  { %v1311_v46 = vadd.f32 %v1586_v43, %v1303_v44  ;;  %v1304_v47 = vmul.f32 %v1585_v40, %v1296_v45 }
 0x714   :  { %v1312_v52 = vadd.f32 %v1586_v43, %v1304_v47  ;;  %v1323_v53 = vmul.f32 %v2274_v49, %v1311_v46 }
 0x716   :  { %v1324_v54 = vmul.f32 %v2276_v51, %v1312_v52  ;;  %v1597_v52 = vld [vmem:[%s2337_s15] ss:$0 sm:$0xff] }
 0x718   :  { %v1325_v55 = vpack.c.bf16 %v1324_v54, %v1323_v53 }
 0x71a   :  { %1790 = vmatmul.mubr.msk.bf16.vlgmr.msra.gmra.mrb[40].mxu0 %vm82_vm1, %v1325_v55 }
 0x7ed   :  { %v1386_v59 = vpop.f32.mrb[40].mxu0 }
 0x7ee   :  { %v1387_v60 = vadd.f32 %v1587_v58, %v1386_v59  ;;  %v1791_v61 = vpop.f32.mrb[41].mxu0 }
 0x7ef   :  { %v1389_v62 = vpop.f32.mrb[42].mxu0 }
 0x7f0   :  { %v1395_v63 = vmul.f32 0.044715, %v1387_v60  ;;  %v1390_v1 = vadd.f32 %v1587_v58, %v1389_v62  ;;  %v1792_v2 = vpop.f32.mrb[43].mxu0  ;;  %v1393_v16 = vmul.f32 0.5, %v1387_v60 }
 0x7f2   :  { %v1397_v3 = vmul.f32 %v1395_v63, %v1387_v60  ;;  %v1396_v4 = vmul.f32 0.044715, %v1390_v1  ;;  %v1394_v17 = vmul.f32 0.5, %v1390_v1 }
 0x7f4   :  { %v1399_v6 = vmul.f32 %v1397_v3, %v1387_v60  ;;  %v1398_v7 = vmul.f32 %v1396_v4, %v1390_v1 }
 0x7f6   :  { %v1401_v8 = vadd.f32 %v1399_v6, %v1387_v60  ;;  %v1400_v11 = vmul.f32 %v1398_v7, %v1390_v1 }
 0x7f8   :  { %v1403_v12 = vmul.f32 0.7978846, %v1401_v8  ;;  %v1402_v0 = vadd.f32 %v1400_v11, %v1390_v1 }
 0x7fa   :  { %1881 = vtanh.f32 %v1403_v12  ;;  %v1404_v13 = vmul.f32 0.7978846, %v1402_v0 }
 0x7fc   :  { %1883 = vtanh.f32 %v1404_v13 }
 0x804   :  { %v1882_v5 = vpop.eup %1881 }
 0x805   :  { %v1407_v14 = vadd.f32 1.0, %v1882_v5 }
 0x806   :  { %v1884_v15 = vpop.eup %1883 }
 0x807   :  { %v1408_v18 = vadd.f32 1.0, %v1884_v15  ;;  %v1409_v19 = vmul.f32 %v1407_v14, %v1393_v16 }
 0x809   :  { %v1410_v20 = vmul.f32 %v1408_v18, %v1394_v17 }
 0x80b   :  { %v1411_v21 = vpack.c.bf16 %v1410_v20, %v1409_v19 }
 0x80d   :  { %1802 = vmatmul.mubr.msk.bf16.vlgmr.msra.gmra.mrb[40].mxu1 %vm1451_vm13, %v1411_v21 }
 0x8e0   :  { %v1489_v23 = vpop.f32.mrb[40].mxu1 }
 0x8e1   :  { %v1490_v24 = vadd.f32 %v1591_v22, %v1489_v23  ;;  %v1803_v25 = vpop.f32.mrb[41].mxu1 }
 0x8e2   :  { %v1492_v26 = vpop.f32.mrb[42].mxu1 }
 0x8e3   :  { %v1493_v27 = vadd.f32 %v1591_v22, %v1492_v26  ;;  %v1804_v28 = vpop.f32.mrb[43].mxu1  ;;  %v1496_v29 = vadd.f32 %v1490_v24, %v1323_v53 }
 0x8e5   :  { %v1500_v9 = vsel %vm82_vm1, %v1496_v29, 0.0  ;;  %v1497_v10 = vadd.f32 %v1493_v27, %v1324_v54  ;;  %v1598_v54 = vld [vmem:[%s2338_s16] ss:$0 sm:$0xff] }
 0x8e6   :  { %1501 = vadd.xlane.f32.xlu1 %v1500_v9 }
 0x8e7   :  { %v1503_v30 = vsel %vm82_vm1, %v1497_v10, 0.0 }
 0x8e8   :  { %1504 = vadd.xlane.f32.xlu0 %v1503_v30 }
 0x973   :  { %v1502_v31 = vpop.xlane.xlu1 %1501 }
 0x974   :  { %v1506_v32 = vmul.f32 0.03125, %v1502_v31 }
 0x975   :  { %v1505_v33 = vpop.xlane.xlu0 %1504 }
 0x976   :  { %v1508_v34 = vsub.f32 %v1496_v29, %v1506_v32  ;;  %v1507_v35 = vmul.f32 0.03125, %v1505_v33 }
 0x978   :  { %v1509_v36 = vsub.f32 %v1497_v10, %v1507_v35  ;;  %v1510_v37 = vmul.f32 %v1508_v34, %v1508_v34 }
 0x97a   :  { %v1512_v38 = vsel %vm82_vm1, %v1510_v37, 0.0  ;;  %v1511_v39 = vmul.f32 %v1509_v36, %v1509_v36 }
 0x97b   :  { %1513 = vadd.xlane.f32.xlu1 %v1512_v38 }
 0x97c   :  { %v1515_v40 = vsel %vm82_vm1, %v1511_v39, 0.0 }
 0x97f   :  { %1516 = vadd.xlane.f32.xlu1 %v1515_v40 }
 0xa08   :  { %v1514_v41 = vpop.xlane.xlu1 %1513 }
 0xa09   :  { %v1518_v42 = vmul.f32 0.03125, %v1514_v41 }
 0xa0b   :  { %v1520_v43 = vadd.f32 1e-06, %v1518_v42 }
 0xa0c   :  { %v1517_v44 = vpop.xlane.xlu1 %1516 }
 0xa0d   :  { %1885 = vrsqrt.f32 %v1520_v43  ;;  %v1519_v45 = vmul.f32 0.03125, %v1517_v44 }
 0xa0f   :  { %v1521_v46 = vadd.f32 1e-06, %v1519_v45 }
 0xa11   :  { %1887 = vrsqrt.f32 %v1521_v46 }
 0xa17   :  { %v1886_v47 = vpop.eup %1885 }
 0xa18   :  { %v1524_v53 = vmul.f32 %v1886_v47, %v1508_v34 }
 0xa1a   :  { %v1532_v55 = vmul.f32 %v1597_v52, %v1524_v53 }
 0xa1b   :  { %v1888_v50 = vpop.eup %1887 }
 0xa1c   :  { %v1540_v48 = vadd.f32 %v1598_v54, %v1532_v55  ;;  %v1525_v56 = vmul.f32 %v1888_v50, %v1509_v36 }
 0xa1e   :  { %v1542_v57 = vmul.f32 %v1540_v48, %v2274_v49  ;;  %v1533_v58 = vmul.f32 %v1597_v52, %v1525_v56 }
 0xa20   :  { %1544 = vst.msk [vmem:[%s2339_s17] sm:$0xff] %vm82_vm1, %v1542_v57  ;;  %v1541_v59 = vadd.f32 %v1598_v54, %v1533_v58 }
 0xa22   :  { %v1543_v60 = vmul.f32 %v1541_v59, %v2276_v51 }
 0xa24   :  { %1545 = vst.msk [vmem:[%s2339_s17 + $0x8] sm:$0xff] %vm82_vm1, %v1543_v60 }

// kernel: encoder_forward.3
= control target key start
LH: loop header
LB: loop body
LE: loop exit
PB: predicated region body
PF: predicated region fallthrough
CT: control target
= control target key end

     0   :  { %s2367_s0 = inlined_call_operand.vmem [shape: f32[2,8,32], index: 0, kind: input, shape index: {}]   ;;  %s2368_s1 = inlined_call_operand.vmem [shape: f32[2,8,32], index: 1, kind: input, shape index: {}]   ;;  %s2369_s2 = inlined_call_operand.vmem [shape: f32[2,8,1], index: 2, kind: input, shape index: {}]   ;;  %s2370_s3 = inlined_call_operand.vmem [shape: f32[2,1,8], index: 3, kind: input, shape index: {}]   ;;  %s2371_s4 = inlined_call_operand.vmem [shape: bf16[32,32], index: 4, kind: input, shape index: {}]   ;;  %s2372_s5 = inlined_call_operand.vmem [shape: bf16[32,32], index: 5, kind: input, shape index: {}]   ;;  %s2373_s6 = inlined_call_operand.vmem [shape: bf16[32,32], index: 6, kind: input, shape index: {}]   ;;  %s2374_s7 = inlined_call_operand.vmem [shape: bf16[32,32], index: 7, kind: input, shape index: {}]   ;;  %s2375_s8 = inlined_call_operand.vmem [shape: f32[1,32], index: 8, kind: input, shape index: {}]   ;;  %s2376_s9 = inlined_call_operand.vmem [shape: f32[1,32], index: 9, kind: input, shape index: {}]   ;;  %s2377_s10 = inlined_call_operand.vmem [shape: f32[1,32], index: 10, kind: input, shape index: {}]   ;;  %s2378_s11 = inlined_call_operand.vmem [shape: bf16[32,64], index: 11, kind: input, shape index: {}]   ;;  %s2379_s12 = inlined_call_operand.vmem [shape: f32[1,64], index: 12, kind: input, shape index: {}]   ;;  %s2380_s13 = inlined_call_operand.vmem [shape: bf16[64,32], index: 13, kind: input, shape index: {}]   ;;  %s2381_s14 = inlined_call_operand.vmem [shape: f32[1,32], index: 14, kind: input, shape index: {}]   ;;  %s2382_s15 = inlined_call_operand.vmem [shape: f32[1,32], index: 15, kind: input, shape index: {}]   ;;  %s2383_s16 = inlined_call_operand.vmem [shape: f32[1,32], index: 16, kind: input, shape index: {}]   ;;  %s2384_s17 = inlined_call_operand.hbm [shape: f32[2,8,32], index: 17, kind: output, shape index: {}]  }
   0x1   :  { %2387 = sst [smem:[#allocation5_spill]] %s2367_s0 }
   0x2   :  { %2388 = sst [smem:[#allocation6_spill]] %s2368_s1 }
   0x3   :  { %v1846_v0 = vld [vmem:[%s2371_s4] sm:$0xff]   ;;  %v1928_v1 = vmov 0.0   ;;  %v1848_v3 = vld [vmem:[%s2371_s4 + $0x8] sm:$0xff]   ;;  %vm1929_vm0 = vmmov 0   ;;  %s2389_s1 = sld [smem:[#allocation5_spill]]  ;;  %s2390_s23 = sld [smem:[#allocation6_spill]] }
   0x4   :  { %1670 = vmatprep.subr.bf16.mxu0 %v1928_v1  ;;  %1678 = vmatprep.subr.bf16.mxu1 %v1928_v1  ;;  %v1847_v2 = vld [vmem:[%s2372_s5] sm:$0xff]   ;;  %v1849_v4 = vld [vmem:[%s2372_s5 + $0x8] sm:$0xff]   ;;  %vm83_vm1 = vcmask 261120  }
   0x5   :  { %1671 = vmatpush3.bf16.msra.mxu0 %v1846_v0  ;;  %1674 = vmatprep.mubr.msk.bf16.mxu0 %vm1929_vm0, %v1928_v1  ;;  %v1850_v11 = vld [vmem:[%s2373_s6] sm:$0xff]   ;;  %v1851_v13 = vld [vmem:[%s2373_s6 + $0x8] sm:$0xff]  }
   0x6   :  { %1679 = vmatpush3.bf16.msra.mxu1 %v1847_v2  ;;  %1672 = vmatprep.subr.bf16.mxu0 %v1928_v1 }
   0x7   :  { %1680 = vmatprep.subr.bf16.mxu1 %v1928_v1  ;;  %1682 = vmatprep.mubr.msk.bf16.mxu1 %vm1929_vm0, %v1928_v1 }
   0x9   :  { %v58_v5 = vld [vmem:[%s2389_s1] sm:$0xff]  ;;  %v59_v6 = vld [vmem:[%s2389_s1 + $0x8] sm:$0xff]  ;;  %1673 = vmatpush3.bf16.msra.mxu0 %v1848_v3 }
   0xa   :  { %v60_v7 = vld [vmem:[%s2390_s23] sm:$0xff]  ;;  %v61_v8 = vld [vmem:[%s2390_s23 + $0x8] sm:$0xff]  ;;  %1681 = vmatpush3.bf16.msra.mxu1 %v1849_v4  ;;  %1686 = vmatprep.subr.bf16.mxu0 %v1928_v1 }
   0xb   :  { %v2061_v9 = vadd.f32 %v60_v7, %v58_v5  ;;  %v2063_v10 = vadd.f32 %v61_v8, %v59_v6  ;;  %1694 = vmatprep.subr.bf16.mxu1 %v1928_v1 }
   0xd   :  { %v66_v12 = vpack.c.bf16 %v2063_v10, %v2061_v9 }
   0xf   :  { %1675 = vmatmul.mubr.msk.bf16.vlgmr.msra.gmra.mrb[0].mxu0 %vm83_vm1, %v66_v12  ;;  %1683 = vmatmul.mubr.msk.bf16.vlgmr.msra.gmra.mrb[0].mxu1 %vm83_vm1, %v66_v12 }
  0x10   :  { %1687 = vmatpush3.bf16.msra.mxu0 %v1850_v11  ;;  %1690 = vmatprep.mubr.msk.bf16.mxu0 %vm1929_vm0, %v1928_v1 }
  0x11   :  { %1688 = vmatprep.subr.bf16.mxu0 %v1928_v1  ;;  %1696 = vmatprep.mubr.msk.bf16.mxu1 %vm1929_vm0, %v1928_v1 }
  0x12   :  { %22 = vsyncpa [#allocation3], 0  ;;  %vm296_vm2 = vcmask 64512   ;;  %s1930_s6 = smov 120   ;;  %s1931_s29 = smov 112   ;;  %v1933_v32 = vmov 0   ;;  %v665_v55 = vlaneseq }
  0x13   :  { %s1932_s0 = smov 104   ;;  %1844 = vset.pattern.permute.xlu0 %v1933_v32  ;;  %1845 = vset.pattern.permute.xlu1 %v1933_v32  ;;  %vm801_vm3 = vcmask 1043456   ;;  %v670_v56 = vld [vmem:[%s2370_s3] sm:$0x1]  ;;  %v671_v58 = vld [vmem:[%s2370_s3 + $0x1] sm:$0x1] }
  0x14   :  { %1689 = vmatpush3.bf16.msra.mxu0 %v1851_v13  ;;  %v666_v57 = vshrl.u32 %v665_v55, 7  ;;  %vm672_vm4 = vcmp.eq.f32.partialorder %v670_v56, 0.0  ;;  %vm673_vm5 = vcmp.eq.f32.partialorder %v671_v58, 0.0  ;;  %v668_v62 = vand.u32 127, %v665_v55  ;;  %s1934_s3 = smov 8   ;;  %s1935_s23 = smov 16  }
  0x15   :  { %1700 = vmatprep.subr.bf16.mxu0 %v1928_v1  ;;  %v676_v60 = vsel %vm672_vm4, 1, %v1933_v32  ;;  %v677_v61 = vsel %vm673_vm5, 1, %v1933_v32  ;;  %vm1193_vm11 = vcmask 130048   ;;  %vm1196_vm12 = vcmask 195584   ;;  %s1937_s5 = smov [#allocation2]  }
  0x16   :  { %v680_v59 = vsub.s32 0, %v666_v57  ;;  %vm669_vm6 = vcmp.gt.s32.totalorder %v668_v62, %v666_v57  ;;  %vm1452_vm13 = vcmask 523264   ;;  %s1552_s26 = sshll.u32 %s1937_s5, 4  ;;  %s1553_s26 = int_to_ptr.vmem [resolvable:$true] %s1552_s26 }
  0x17   :  { %1691 = vmatmul.mubr.msk.bf16.vlgmr.msra.gmra.mrb[4].mxu0 %vm83_vm1, %v66_v12  ;;  %p1909_p1 = scmp.lt.s32.totalorder %s1553_s26, %s1553_s26 }
  0x18   :  { %1702 = vmatprep.mubr.msk.bf16.mxu0 %vm1929_vm0, %v1928_v1  ;;  %v681_v63 = vrot.slane %v676_v60, %v680_v59  ;;  %v685_v0 = vrot.slane %v677_v61, %v680_v59 }
  0x1a   :  { %vm686_vm7 = vcmp.eq.s32.totalorder %v681_v63, 1  ;;  %vm687_vm8 = vcmp.eq.s32.totalorder %v685_v0, 1 }
  0x1b   :  { %vm2154_vm9 = vmor %vm669_vm6, %vm686_vm7 }
  0x1c   :  { %vm2158_vm10 = vmor %vm669_vm6, %vm687_vm8 }
  0xe2   :  { %v121_v14 = vpop.f32.mrb[0].mxu0  ;;  %v178_v15 = vpop.f32.mrb[0].mxu1 }
  0xe3   :  { %v1612_v16 = vpack.c.bf16 %v121_v14, %v121_v14  ;;  %v1614_v17 = vpack.c.bf16 %v178_v15, %v178_v15  ;;  %v1684_v18 = vpop.f32.mrb[1].mxu1  ;;  %v1676_v19 = vpop.f32.mrb[1].mxu0 }
  0xe4   :  { %v181_v20 = vpop.f32.mrb[2].mxu1  ;;  %v124_v21 = vpop.f32.mrb[2].mxu0 }
  0xe5   :  { %v1615_v22 = vpack.c.bf16 %v181_v20, %v181_v20  ;;  %266 = vrot.lane.b32.xlu0 %v1614_v17, %s1930_s6  ;;  %v1685_v23 = vpop.f32.mrb[3].mxu1  ;;  %248 = vrot.lane.b32.xlu1 %v1612_v16, %s1930_s6  ;;  %v1613_v24 = vpack.c.bf16 %v124_v21, %v124_v21  ;;  %v301_v25 = vsel %vm296_vm2, %v1614_v17, 0  ;;  %v1677_v26 = vpop.f32.mrb[3].mxu0 }
  0xe6   :  { %1695 = vmatpush3.bf16.xpose.msra.mxu1 %v301_v25 }
  0xe7   :  { %v347_v27 = vsel %vm296_vm2, %v1615_v22, 0  ;;  %1706 = vmatprep.subr.bf16.mxu1 %v1928_v1 }
  0xe8   :  { %1701 = vmatpush3.bf16.xpose.msra.mxu0 %v347_v27 }
  0xe9   :  { %268 = vrot.lane.b32.xlu0 %v1615_v22, %s1930_s6  ;;  %250 = vrot.lane.b32.xlu1 %v1613_v24, %s1930_s6 }
  0xea   :  { %1712 = vmatprep.subr.bf16.mxu0 %v1928_v1  ;;  %v235_v28 = vpop.f32.mrb[4].mxu0 }
  0xeb   :  { %v1692_v29 = vpop.f32.mrb[5].mxu0  ;;  %v2126_v48 = vpack.c.bf16 %v235_v28, %v235_v28 }
  0xec   :  { %v238_v30 = vpop.f32.mrb[6].mxu0 }
  0xed   :  { %270 = vrot.lane.b32.xlu0 %v1614_v17, %s1931_s29  ;;  %1697 = vmatmul.mubr.msk.bf16.vlgmr.msra.gmra.mrb[4].mxu1 %vm296_vm2, %v1612_v16  ;;  %v1693_v31 = vpop.f32.mrb[7].mxu0  ;;  %v2133_v50 = vpack.c.bf16 %v238_v30, %v238_v30  ;;  %v803_v51 = vsel %vm801_vm3, %v2126_v48, 0 }
  0xee   :  { %272 = vrot.lane.b32.xlu1 %v1615_v22, %s1931_s29  ;;  %1708 = vmatprep.mubr.msk.bf16.mxu1 %vm1929_vm0, %v1928_v1 }
  0xef   :  { %1703 = vmatmul.mubr.msk.bf16.vlgmr.msra.gmra.mrb[8].mxu0 %vm296_vm2, %v1613_v24  ;;  %v849_v53 = vsel %vm801_vm3, %v2133_v50, 0 }
  0xf0   :  { %1714 = vmatprep.mubr.msk.bf16.mxu0 %vm1929_vm0, %v1928_v1 }
  0xf1   :  { %252 = vrot.lane.b32.xlu0 %v1612_v16, %s1931_s29 }
  0xf2   :  { %254 = vrot.lane.b32.xlu1 %v1613_v24, %s1931_s29 }
  0xf5   :  { %274 = vrot.lane.b32.xlu0 %v1614_v17, %s1932_s0 }
  0xf6   :  { %276 = vrot.lane.b32.xlu1 %v1615_v22, %s1932_s0 }
  0xf9   :  { %256 = vrot.lane.b32.xlu0 %v1612_v16, %s1932_s0 }
  0xfa   :  { %258 = vrot.lane.b32.xlu1 %v1613_v24, %s1932_s0 }
 0x157   :  { %v267_v33 = vpop.permute.xlu0 %266  ;;  %v249_v34 = vpop.permute.xlu1 %248 }
 0x158   :  { %v393_v35 = vsel %vm296_vm2, %v267_v33, 0 }
 0x159   :  { %1707 = vmatpush3.bf16.xpose.msra.mxu1 %v393_v35 }
 0x15a   :  { %1718 = vmatprep.subr.bf16.mxu1 %v1928_v1 }
 0x15b   :  { %v269_v36 = vpop.permute.xlu0 %268  ;;  %v251_v37 = vpop.permute.xlu1 %250 }
 0x15c   :  { %v439_v38 = vsel %vm296_vm2, %v269_v36, 0 }
 0x15d   :  { %1713 = vmatpush3.bf16.xpose.msra.mxu0 %v439_v38 }
 0x15e   :  { %1724 = vmatprep.subr.bf16.mxu0 %v1928_v1 }
 0x15f   :  { %v271_v39 = vpop.permute.xlu0 %270 }
 0x160   :  { %v485_v40 = vsel %vm296_vm2, %v271_v39, 0  ;;  %v273_v41 = vpop.permute.xlu1 %272  ;;  %1709 = vmatmul.mubr.msk.bf16.vlgmr.msra.gmra.mrb[8].mxu1 %vm296_vm2, %v249_v34 }
 0x161   :  { %1719 = vmatpush3.bf16.xpose.msra.mxu1 %v485_v40  ;;  %1720 = vmatprep.mubr.msk.bf16.mxu1 %vm1929_vm0, %v1928_v1  ;;  %v531_v43 = vsel %vm296_vm2, %v273_v41, 0 }
 0x162   :  { %1730 = vmatprep.subr.bf16.mxu1 %v1928_v1 }
 0x163   :  { %v253_v42 = vpop.permute.xlu0 %252 }
 0x164   :  { %v255_v44 = vpop.permute.xlu1 %254  ;;  %1715 = vmatmul.mubr.msk.bf16.vlgmr.msra.gmra.mrb[12].mxu0 %vm296_vm2, %v251_v37 }
 0x165   :  { %1725 = vmatpush3.bf16.xpose.msra.mxu0 %v531_v43  ;;  %1726 = vmatprep.mubr.msk.bf16.mxu0 %vm1929_vm0, %v1928_v1 }
 0x166   :  { %1736 = vmatprep.subr.bf16.mxu0 %v1928_v1 }
 0x167   :  { %v275_v45 = vpop.permute.xlu0 %274 }
 0x168   :  { %v577_v46 = vsel %vm296_vm2, %v275_v45, 0  ;;  %1721 = vmatmul.mubr.msk.bf16.vlgmr.msra.gmra.mrb[12].mxu1 %vm296_vm2, %v253_v42  ;;  %v277_v47 = vpop.permute.xlu1 %276 }
 0x169   :  { %1731 = vmatpush3.bf16.xpose.msra.mxu1 %v577_v46  ;;  %1732 = vmatprep.mubr.msk.bf16.mxu1 %vm1929_vm0, %v1928_v1  ;;  %v623_v49 = vsel %vm296_vm2, %v277_v47, 0 }
 0x16a   :  { %1742 = vmatprep.subr.bf16.mxu1 %v1928_v1 }
 0x16b   :  { %v257_v52 = vpop.permute.xlu0 %256 }
 0x16c   :  { %1727 = vmatmul.mubr.msk.bf16.vlgmr.msra.gmra.mrb[16].mxu0 %vm296_vm2, %v255_v44  ;;  %v259_v54 = vpop.permute.xlu1 %258 }
 0x16d   :  { %1737 = vmatpush3.bf16.xpose.msra.mxu0 %v623_v49  ;;  %1738 = vmatprep.mubr.msk.bf16.mxu0 %vm1929_vm0, %v1928_v1 }
 0x16e   :  { %1748 = vmatprep.subr.bf16.mxu0 %v1928_v1 }
 0x170   :  { %1733 = vmatmul.mubr.msk.bf16.vlgmr.msra.gmra.mrb[16].mxu1 %vm296_vm2, %v257_v52 }
 0x171   :  { %1743 = vmatpush3.bf16.msra.mxu1 %v803_v51  ;;  %1744 = vmatprep.mubr.msk.bf16.mxu1 %vm1929_vm0, %v1928_v1 }
 0x172   :  { %1754 = vmatprep.subr.bf16.mxu1 %v1928_v1 }
 0x174   :  { %1739 = vmatmul.mubr.msk.bf16.vlgmr.msra.gmra.mrb[20].mxu0 %vm296_vm2, %v259_v54 }
 0x175   :  { %1749 = vmatpush3.bf16.msra.mxu0 %v849_v53  ;;  %1750 = vmatprep.mubr.msk.bf16.mxu0 %vm1929_vm0, %v1928_v1 }
 0x176   :  { %1760 = vmatprep.subr.bf16.mxu0 %v1928_v1 }
 0x1c0   :  { %v337_v3 = vpop.f32.mrb[4].mxu1 }
 0x1c1   :  { %v2164_v5 = vsel %vm2154_vm9, -1e+09, %v337_v3  ;;  %v1698_v6 = vpop.f32.mrb[5].mxu1 }
 0x1c2   :  { %v340_v7 = vpop.f32.mrb[6].mxu1  ;;  %v383_v8 = vpop.f32.mrb[8].mxu0  ;;  %v702_v11 = vsel %vm296_vm2, %v2164_v5, -inf }
 0x1c3   :  { %v695_v12 = vsel %vm2158_vm10, -1e+09, %v383_v8  ;;  %703 = vmax.xlane.f32.xlu0 %v702_v11  ;;  %v1699_v13 = vpop.f32.mrb[7].mxu1  ;;  %v1704_v14 = vpop.f32.mrb[9].mxu0 }
 0x1c4   :  { %v386_v15 = vpop.f32.mrb[10].mxu0  ;;  %v705_v16 = vsel %vm296_vm2, %v695_v12, -inf }
 0x1c5   :  { %706 = vmax.xlane.f32.xlu1 %v705_v16  ;;  %v1705_v17 = vpop.f32.mrb[11].mxu0 }
 0x233   :  { %v429_v18 = vpop.f32.mrb[8].mxu1 }
 0x234   :  { %v696_v19 = vsel %vm2154_vm9, -1e+09, %v429_v18  ;;  %v1710_v20 = vpop.f32.mrb[9].mxu1 }
 0x235   :  { %v432_v21 = vpop.f32.mrb[10].mxu1  ;;  %v708_v22 = vsel %vm296_vm2, %v696_v19, -inf }
 0x236   :  { %709 = vmax.xlane.f32.xlu0 %v708_v22  ;;  %v1711_v23 = vpop.f32.mrb[11].mxu1 }
 0x237   :  { %v475_v24 = vpop.f32.mrb[12].mxu0 }
 0x238   :  { %v697_v25 = vsel %vm2158_vm10, -1e+09, %v475_v24  ;;  %v1716_v26 = vpop.f32.mrb[13].mxu0 }
 0x239   :  { %v478_v27 = vpop.f32.mrb[14].mxu0  ;;  %v711_v28 = vsel %vm296_vm2, %v697_v25, -inf }
 0x23a   :  { %712 = vmax.xlane.f32.xlu0 %v711_v28  ;;  %v1717_v29 = vpop.f32.mrb[15].mxu0 }
 0x23b   :  { %v521_v30 = vpop.f32.mrb[12].mxu1 }
 0x23c   :  { %v2179_v31 = vsel %vm2154_vm9, -1e+09, %v521_v30  ;;  %v1722_v32 = vpop.f32.mrb[13].mxu1 }
 0x23d   :  { %v524_v33 = vpop.f32.mrb[14].mxu1  ;;  %v714_v34 = vsel %vm296_vm2, %v2179_v31, -inf }
 0x23e   :  { %v1723_v35 = vpop.f32.mrb[15].mxu1  ;;  %715 = vmax.xlane.f32.xlu1 %v714_v34 }
 0x23f   :  { %v567_v36 = vpop.f32.mrb[16].mxu0 }
 0x240   :  { %v2185_v37 = vsel %vm2158_vm10, -1e+09, %v567_v36  ;;  %v1728_v38 = vpop.f32.mrb[17].mxu0 }
 0x241   :  { %v570_v39 = vpop.f32.mrb[18].mxu0  ;;  %v717_v40 = vsel %vm296_vm2, %v2185_v37, -inf }
 0x242   :  { %718 = vmax.xlane.f32.xlu0 %v717_v40  ;;  %v1729_v41 = vpop.f32.mrb[19].mxu0 }
 0x243   :  { %v613_v42 = vpop.f32.mrb[16].mxu1 }
 0x244   :  { %v700_v43 = vsel %vm2154_vm9, -1e+09, %v613_v42  ;;  %v1734_v44 = vpop.f32.mrb[17].mxu1 }
 0x245   :  { %v616_v45 = vpop.f32.mrb[18].mxu1  ;;  %v720_v46 = vsel %vm296_vm2, %v700_v43, -inf }
 0x246   :  { %v1735_v47 = vpop.f32.mrb[19].mxu1  ;;  %721 = vmax.xlane.f32.xlu1 %v720_v46 }
 0x247   :  { %v659_v49 = vpop.f32.mrb[20].mxu0 }
 0x248   :  { %v701_v51 = vsel %vm2158_vm10, -1e+09, %v659_v49  ;;  %v1740_v52 = vpop.f32.mrb[21].mxu0 }
 0x249   :  { %v662_v53 = vpop.f32.mrb[22].mxu0  ;;  %v723_v54 = vsel %vm296_vm2, %v701_v51, -inf }
 0x24a   :  { %724 = vmax.xlane.f32.xlu0 %v723_v54  ;;  %v1741_v55 = vpop.f32.mrb[23].mxu0 }
 0x250   :  { %v704_v60 = vpop.xlane.xlu0 %703 }
 0x251   :  { %v726_v62 = vsub.f32 %v2164_v5, %v704_v60 }
 0x252   :  { %v707_v56 = vpop.xlane.xlu1 %706 }
 0x253   :  { %v727_v57 = vsub.f32 %v695_v12, %v707_v56  ;;  %v734_v63 = vmul.f32 1.442695, %v726_v62 }
 0x255   :  { %v736_v58 = vmul.f32 1.442695, %v727_v57 }
 0x257   :  { %1860 = vpow2.f32 %v736_v58  ;;  %284 = vrot.lane.b32.xlu1 %v2126_v48, %s1930_s6 }
 0x258   :  { %1862 = vpow2.f32 %v734_v63 }
 0x261   :  { %v1861_v59 = vpop.eup %1860 }
 0x262   :  { %v753_v61 = vsel %vm296_vm2, %v1861_v59, 0.0  ;;  %v1863_v0 = vpop.eup %1862 }
 0x263   :  { %754 = vadd.xlane.f32.xlu0 %v753_v61  ;;  %v750_v2 = vsel %vm296_vm2, %v1863_v0, 0.0 }
 0x27b   :  { %751 = vadd.xlane.f32.xlu1 %v750_v2 }
 0x2c3   :  { %v710_v3 = vpop.xlane.xlu0 %709 }
 0x2c4   :  { %v728_v4 = vsub.f32 %v696_v19, %v710_v3 }
 0x2c6   :  { %v738_v6 = vmul.f32 1.442695, %v728_v4 }
 0x2c7   :  { %v713_v7 = vpop.xlane.xlu0 %712 }
 0x2c8   :  { %1864 = vpow2.f32 %v738_v6  ;;  %v729_v8 = vsub.f32 %v697_v25, %v713_v7 }
 0x2ca   :  { %v740_v11 = vmul.f32 1.442695, %v729_v8 }
 0x2cb   :  { %v716_v18 = vpop.xlane.xlu1 %715 }
 0x2cc   :  { %1866 = vpow2.f32 %v740_v11  ;;  %v730_v19 = vsub.f32 %v2179_v31, %v716_v18 }
 0x2ce   :  { %v742_v22 = vmul.f32 1.442695, %v730_v19 }
 0x2cf   :  { %v719_v15 = vpop.xlane.xlu0 %718 }
 0x2d0   :  { %v731_v20 = vsub.f32 %v2185_v37, %v719_v15 }
 0x2d2   :  { %v2200_v12 = vpop.eup %1864  ;;  %v744_v25 = vmul.f32 1.442695, %v731_v20 }
 0x2d3   :  { %v756_v13 = vsel %vm296_vm2, %v2200_v12, 0.0  ;;  %v722_v21 = vpop.xlane.xlu1 %721 }
 0x2d4   :  { %757 = vadd.xlane.f32.xlu1 %v756_v13  ;;  %v732_v23 = vsub.f32 %v700_v43, %v722_v21 }
 0x2d6   :  { %v2204_v5 = vpop.eup %1866  ;;  %v746_v28 = vmul.f32 1.442695, %v732_v23 }
 0x2d7   :  { %v759_v14 = vsel %vm296_vm2, %v2204_v5, 0.0  ;;  %v725_v16 = vpop.xlane.xlu0 %724  ;;  %v285_v31 = vpop.permute.xlu1 %284 }
 0x2d8   :  { %760 = vadd.xlane.f32.xlu0 %v759_v14  ;;  %v733_v26 = vsub.f32 %v701_v51, %v725_v16  ;;  %v895_v44 = vsel %vm801_vm3, %v285_v31, 0 }
 0x2da   :  { %v748_v30 = vmul.f32 1.442695, %v733_v26 }
 0x2e5   :  { %288 = vrot.lane.b32.xlu1 %v2126_v48, %s1931_s29 }
 0x2e9   :  { %290 = vrot.lane.b32.xlu1 %v2133_v50, %s1931_s29 }
 0x2ee   :  { %286 = vrot.lane.b32.xlu0 %v2133_v50, %s1930_s6 }
 0x2f0   :  { %v755_v17 = vpop.xlane.xlu0 %754 }
 0x2f1   :  { %1868 = vrcp.f32 %v755_v17 }
 0x2f2   :  { %1870 = vpow2.f32 %v742_v22 }
 0x2f3   :  { %1872 = vpow2.f32 %v744_v25 }
 0x2f4   :  { %1874 = vpow2.f32 %v746_v28 }
 0x2f5   :  { %1876 = vpow2.f32 %v748_v30 }
 0x2fb   :  { %v1869_v24 = vpop.eup %1868 }
 0x2fc   :  { %v783_v27 = vmul.f32 %v1869_v24, %v1861_v59  ;;  %v1871_v32 = vpop.eup %1870 }
 0x2fd   :  { %v1873_v34 = vpop.eup %1872  ;;  %v762_v36 = vsel %vm296_vm2, %v1871_v32, 0.0 }
 0x2fe   :  { %v791_v29 = vpack.c.bf16 %v783_v27, %v783_v27  ;;  %v2219_v35 = vpop.eup %1874  ;;  %v765_v37 = vsel %vm296_vm2, %v1873_v34, 0.0 }
 0x2ff   :  { %v2223_v38 = vpop.eup %1876  ;;  %v768_v39 = vsel %vm296_vm2, %v2219_v35, 0.0 }
 0x300   :  { %1751 = vmatmul.mubr.msk.bf16.vlgmr.msra.gmra.mrb[24].mxu0 %vm296_vm2, %v791_v29  ;;  %v771_v40 = vsel %vm296_vm2, %v2223_v38, 0.0 }
 0x301   :  { %1762 = vmatprep.mubr.msk.bf16.mxu0 %vm1929_vm0, %v1928_v1 }
 0x308   :  { %v752_v33 = vpop.xlane.xlu1 %751 }
 0x309   :  { %1878 = vrcp.f32 %v752_v33 }
 0x30d   :  { %763 = vadd.xlane.f32.xlu1 %v762_v36  ;;  %766 = vadd.xlane.f32.xlu0 %v765_v37  ;;  %v1853_v37 = vld [vmem:[%s2374_s7 + $0x8] sm:$0xff]  }
 0x311   :  { %769 = vadd.xlane.f32.xlu1 %v768_v39  ;;  %772 = vadd.xlane.f32.xlu0 %v771_v40 }
 0x313   :  { %v1879_v41 = vpop.eup %1878 }
 0x314   :  { %v782_v42 = vmul.f32 %v1879_v41, %v1863_v0 }
 0x316   :  { %v790_v43 = vpack.c.bf16 %v782_v42, %v782_v42 }
 0x318   :  { %1745 = vmatmul.mubr.msk.bf16.vlgmr.msra.gmra.mrb[20].mxu1 %vm296_vm2, %v790_v43 }
 0x319   :  { %1755 = vmatpush3.bf16.msra.mxu1 %v895_v44  ;;  %1756 = vmatprep.mubr.msk.bf16.mxu1 %vm1929_vm0, %v1928_v1 }
 0x31a   :  { %1766 = vmatprep.subr.bf16.mxu1 %v1928_v1 }
 0x322   :  { %294 = vrot.lane.b32.xlu1 %v2133_v50, %s1932_s0 }
 0x327   :  { %292 = vrot.lane.b32.xlu0 %v2126_v48, %s1932_s0 }
 0x361   :  { %v758_v45 = vpop.xlane.xlu1 %757 }
 0x362   :  { %1880 = vrcp.f32 %v758_v45 }
 0x365   :  { %v761_v46 = vpop.xlane.xlu0 %760  ;;  %v289_v52 = vpop.permute.xlu1 %288 }
 0x366   :  { %1882 = vrcp.f32 %v761_v46  ;;  %v987_v50 = vsel %vm801_vm3, %v289_v52, 0 }
 0x369   :  { %v287_v47 = vpop.permute.xlu0 %286  ;;  %v291_v56 = vpop.permute.xlu1 %290 }
 0x36a   :  { %v941_v49 = vsel %vm801_vm3, %v287_v47, 0  ;;  %v1033_v58 = vsel %vm801_vm3, %v291_v56, 0 }
 0x36b   :  { %1761 = vmatpush3.bf16.msra.mxu0 %v941_v49 }
 0x36c   :  { %v1881_v51 = vpop.eup %1880  ;;  %1772 = vmatprep.subr.bf16.mxu0 %v1928_v1 }
 0x36d   :  { %v784_v53 = vmul.f32 %v1881_v51, %v2200_v12 }
 0x36f   :  { %v792_v54 = vpack.c.bf16 %v784_v53, %v784_v53 }
 0x370   :  { %v1883_v55 = vpop.eup %1882 }
 0x371   :  { %v785_v48 = vmul.f32 %v1883_v55, %v2204_v5  ;;  %1757 = vmatmul.mubr.msk.bf16.vlgmr.msra.gmra.mrb[24].mxu1 %vm296_vm2, %v792_v54 }
 0x372   :  { %1767 = vmatpush3.bf16.msra.mxu1 %v987_v50  ;;  %1768 = vmatprep.mubr.msk.bf16.mxu1 %vm1929_vm0, %v1928_v1 }
 0x373   :  { %v793_v57 = vpack.c.bf16 %v785_v48, %v785_v48  ;;  %1778 = vmatprep.subr.bf16.mxu1 %v1928_v1 }
 0x375   :  { %1763 = vmatmul.mubr.msk.bf16.vlgmr.msra.gmra.mrb[28].mxu0 %vm296_vm2, %v793_v57 }
 0x376   :  { %1773 = vmatpush3.bf16.msra.mxu0 %v1033_v58  ;;  %1774 = vmatprep.mubr.msk.bf16.mxu0 %vm1929_vm0, %v1928_v1 }
 0x377   :  { %1784 = vmatprep.subr.bf16.mxu0 %v1928_v1 }
 0x39a   :  { %v764_v59 = vpop.xlane.xlu1 %763  ;;  %v767_v60 = vpop.xlane.xlu0 %766 }
 0x39b   :  { %1884 = vrcp.f32 %v764_v59 }
 0x39c   :  { %1886 = vrcp.f32 %v767_v60 }
 0x39e   :  { %v770_v61 = vpop.xlane.xlu1 %769  ;;  %v773_v62 = vpop.xlane.xlu0 %772 }
 0x39f   :  { %1888 = vrcp.f32 %v770_v61 }
 0x3a0   :  { %1890 = vrcp.f32 %v773_v62 }
 0x3a2   :  { %v293_v4 = vpop.permute.xlu0 %292  ;;  %v295_v6 = vpop.permute.xlu1 %294 }
 0x3a3   :  { %v1079_v13 = vsel %vm801_vm3, %v293_v4, 0  ;;  %v1125_v5 = vsel %vm801_vm3, %v295_v6, 0 }
 0x3a5   :  { %v1885_v63 = vpop.eup %1884 }
 0x3a6   :  { %v1887_v0 = vpop.eup %1886  ;;  %v786_v2 = vmul.f32 %v1885_v63, %v1871_v32 }
 0x3a7   :  { %v787_v3 = vmul.f32 %v1887_v0, %v1873_v34 }
 0x3a8   :  { %v794_v7 = vpack.c.bf16 %v786_v2, %v786_v2 }
 0x3a9   :  { %v1889_v8 = vpop.eup %1888  ;;  %v795_v11 = vpack.c.bf16 %v787_v3, %v787_v3 }
 0x3aa   :  { %v1891_v12 = vpop.eup %1890  ;;  %1769 = vmatmul.mubr.msk.bf16.vlgmr.msra.gmra.mrb[28].mxu1 %vm296_vm2, %v794_v7  ;;  %v788_v14 = vmul.f32 %v1889_v8, %v2219_v35  ;;  %v1852_v35 = vld [vmem:[%s2374_s7] sm:$0xff]   ;;  %s1936_s7 = smov 24  }
 0x3ab   :  { %1775 = vmatmul.mubr.msk.bf16.vlgmr.msra.gmra.mrb[32].mxu0 %vm296_vm2, %v795_v11  ;;  %1779 = vmatpush3.bf16.msra.mxu1 %v1079_v13  ;;  %v789_v15 = vmul.f32 %v1891_v12, %v2223_v38  ;;  %v1594_v11 = vld [vmem:[%s2375_s8] ss:$0 sm:$0xff] }
 0x3ac   :  { %1785 = vmatpush3.bf16.msra.mxu0 %v1125_v5  ;;  %1780 = vmatprep.mubr.msk.bf16.mxu1 %vm1929_vm0, %v1928_v1  ;;  %v796_v16 = vpack.c.bf16 %v788_v14, %v788_v14 }
 0x3ad   :  { %1786 = vmatprep.mubr.msk.bf16.mxu0 %vm1929_vm0, %v1928_v1  ;;  %1790 = vmatprep.subr.bf16.mxu1 %v1928_v1  ;;  %v797_v17 = vpack.c.bf16 %v789_v15, %v789_v15 }
 0x3ae   :  { %1798 = vmatprep.subr.bf16.mxu0 %v1928_v1 }
 0x3b2   :  { %1781 = vmatmul.mubr.msk.bf16.vlgmr.msra.gmra.mrb[32].mxu1 %vm296_vm2, %v796_v16 }
 0x3b3   :  { %1787 = vmatmul.mubr.msk.bf16.vlgmr.msra.gmra.mrb[36].mxu0 %vm296_vm2, %v797_v17  ;;  %1794 = vmatprep.mubr.msk.bf16.mxu1 %vm1929_vm0, %v1928_v1 }
 0x3b4   :  { %1802 = vmatprep.mubr.msk.bf16.mxu0 %vm1929_vm0, %v1928_v1  ;;  %1791 = vmatpush3.bf16.msra.mxu1 %v1852_v35 }
 0x3b5   :  { %1792 = vmatprep.subr.bf16.mxu1 %v1928_v1 }
 0x3b8   :  { %1793 = vmatpush3.bf16.msra.mxu1 %v1853_v37 }
 0x3b9   :  { %1806 = vmatprep.subr.bf16.mxu1 %v1928_v1 }
 0x3d3   :  { %v885_v18 = vpop.f32.mrb[24].mxu0 }
 0x3d4   :  { %v1752_v19 = vpop.f32.mrb[25].mxu0 }
 0x3d5   :  { %v888_v20 = vpop.f32.mrb[26].mxu0 }
 0x3d6   :  { %v1753_v21 = vpop.f32.mrb[27].mxu0 }
 0x3eb   :  { %v839_v22 = vpop.f32.mrb[20].mxu1 }
 0x3ec   :  { %v1746_v23 = vpop.f32.mrb[21].mxu1 }
 0x3ed   :  { %v842_v24 = vpop.f32.mrb[22].mxu1 }
 0x3ee   :  { %v1747_v25 = vpop.f32.mrb[23].mxu1 }
 0x444   :  { %v931_v26 = vpop.f32.mrb[24].mxu1 }
 0x445   :  { %v1758_v27 = vpop.f32.mrb[25].mxu1 }
 0x446   :  { %v934_v28 = vpop.f32.mrb[26].mxu1 }
 0x447   :  { %v1759_v29 = vpop.f32.mrb[27].mxu1 }
 0x448   :  { %v977_v30 = vpop.f32.mrb[28].mxu0 }
 0x449   :  { %v1829_v31 = vpack.i.bf16 %v977_v30, %v931_v26  ;;  %v1764_v32 = vpop.f32.mrb[29].mxu0  ;;  %v64_v30 = vld [vmem:[%s2369_s2] sm:$0xff] }
 0x44a   :  { %v980_v33 = vpop.f32.mrb[30].mxu0  ;;  %v1855_v32 = vld [vmem:[%s2378_s11 + $0x8] sm:$0xff]  }
 0x44b   :  { %1830 = vrot.lane.b32.xlu0 %v1829_v31, %s1934_s3  ;;  %v1765_v34 = vpop.f32.mrb[31].mxu0  ;;  %v1854_v31 = vld [vmem:[%s2378_s11] sm:$0xff]  }
 0x44c   :  { %1799 = vmatpush3.bf16.msra.mxu0 %v1854_v31 }
 0x44d   :  { %1800 = vmatprep.subr.bf16.mxu0 %v1928_v1 }
 0x450   :  { %1801 = vmatpush3.bf16.msra.mxu0 %v1855_v32 }
 0x47d   :  { %v1023_v36 = vpop.f32.mrb[28].mxu1 }
 0x47e   :  { %v1069_v38 = vpop.f32.mrb[32].mxu0  ;;  %v1770_v39 = vpop.f32.mrb[29].mxu1 }
 0x47f   :  { %v1834_v40 = vpack.i.bf16 %v1069_v38, %v1023_v36  ;;  %v1776_v41 = vpop.f32.mrb[33].mxu0  ;;  %v1026_v42 = vpop.f32.mrb[30].mxu1 }
 0x480   :  { %v1072_v43 = vpop.f32.mrb[34].mxu0  ;;  %v1771_v44 = vpop.f32.mrb[31].mxu1 }
 0x481   :  { %1835 = vrot.lane.b32.xlu1 %v1834_v40, %s1935_s23  ;;  %v1777_v45 = vpop.f32.mrb[35].mxu0  ;;  %v1598_v40 = vld [vmem:[%s2376_s9] ss:$0 sm:$0xff] }
 0x482   :  { %v1599_v43 = vld [vmem:[%s2377_s10] ss:$0 sm:$0xff] }
 0x485   :  { %v1115_v46 = vpop.f32.mrb[32].mxu1 }
 0x486   :  { %v1161_v47 = vpop.f32.mrb[36].mxu0  ;;  %v1782_v49 = vpop.f32.mrb[33].mxu1 }
 0x487   :  { %v1839_v51 = vpack.i.bf16 %v1161_v47, %v1115_v46  ;;  %v1788_v52 = vpop.f32.mrb[37].mxu0  ;;  %v1118_v53 = vpop.f32.mrb[34].mxu1 }
 0x488   :  { %v1164_v54 = vpop.f32.mrb[38].mxu0  ;;  %v1783_v55 = vpop.f32.mrb[35].mxu1 }
 0x489   :  { %1840 = vrot.lane.b32.xlu0 %v1839_v51, %s1936_s7  ;;  %v1789_v50 = vpop.f32.mrb[39].mxu0 }
 0x48a   :  { %v1856_v50 = vld [vmem:[%s2380_s13] sm:$0xff]  }
 0x4bd   :  { %v1831_v48 = vpop.permute.xlu0 %1830 }
 0x4be   :  { %v1833_v57 = vunpack.i.h.bf16 %v1831_v48  ;;  %v1832_v58 = vunpack.i.l.bf16 %v1831_v48  ;;  %v1857_v48 = vld [vmem:[%s2380_s13 + $0x8] sm:$0xff]  }
 0x4c0   :  { %v1192_v62 = vsel %vm296_vm2, %v885_v18, %v1833_v57  ;;  %v1191_v63 = vsel %vm296_vm2, %v839_v22, %v1832_v58  ;;  %v1859_v57 = vld [vmem:[%s2380_s13 + $0x18] sm:$0xff]   ;;  %v1600_v58 = vld [vmem:[%s2379_s12] ss:$0 sm:$0xff] }
 0x4f3   :  { %v1836_v56 = vpop.permute.xlu1 %1835 }
 0x4f4   :  { %v1838_v59 = vunpack.i.h.bf16 %v1836_v56  ;;  %v1837_v60 = vunpack.i.l.bf16 %v1836_v56  ;;  %v1858_v56 = vld [vmem:[%s2380_s13 + $0x10] sm:$0xff]  }
 0x4f6   :  { %v1195_v3 = vsel %vm1193_vm11, %v1192_v62, %v1838_v59  ;;  %v1194_v4 = vsel %vm1193_vm11, %v1191_v63, %v1837_v60 }
 0x4fb   :  { %v1841_v61 = vpop.permute.xlu0 %1840 }
 0x4fc   :  { %v1843_v0 = vunpack.i.h.bf16 %v1841_v61  ;;  %v1842_v2 = vunpack.i.l.bf16 %v1841_v61 }
 0x4fe   :  { %v1198_v6 = vsel %vm1196_vm12, %v1195_v3, %v1843_v0  ;;  %v1197_v7 = vsel %vm1196_vm12, %v1194_v4, %v1842_v2 }
 0x4ff   :  { %v1199_v8 = vpack.c.bf16 %v1198_v6, %v1197_v7 }
 0x501   :  { %1795 = vmatmul.mubr.msk.bf16.vlgmr.msra.gmra.mrb[36].mxu1 %vm83_vm1, %v1199_v8 }
 0x502   :  { %1814 = vmatprep.mubr.msk.bf16.mxu1 %vm1929_vm0, %v1928_v1  ;;  %1807 = vmatpush3.bf16.msra.mxu1 %v1856_v50 }
 0x503   :  { %1808 = vmatprep.subr.bf16.mxu1 %v1928_v1 }
 0x506   :  { %1809 = vmatpush3.bf16.msra.mxu1 %v1857_v48 }
 0x507   :  { %1810 = vmatprep.subr.bf16.mxu1 %v1928_v1 }
 0x50a   :  { %1811 = vmatpush3.bf16.msra.mxu1 %v1858_v56 }
 0x50b   :  { %1812 = vmatprep.subr.bf16.mxu1 %v1928_v1 }
 0x50e   :  { %1813 = vmatpush3.bf16.msra.mxu1 %v1859_v57 }
 0x5d4   :  { %v1260_v12 = vpop.f32.mrb[36].mxu1 }
 0x5d5   :  { %v1261_v13 = vadd.f32 %v1594_v11, %v1260_v12  ;;  %v1796_v5 = vpop.f32.mrb[37].mxu1 }
 0x5d6   :  { %v1263_v14 = vpop.f32.mrb[38].mxu1 }
 0x5d7   :  { %v1264_v15 = vadd.f32 %v1594_v11, %v1263_v14  ;;  %v1797_v16 = vpop.f32.mrb[39].mxu1  ;;  %v1267_v17 = vadd.f32 %v1261_v13, %v2061_v9 }
 0x5d9   :  { %v1271_v18 = vsel %vm83_vm1, %v1267_v17, 0.0  ;;  %v1268_v19 = vadd.f32 %v1264_v15, %v2063_v10  ;;  %v65_v10 = vld [vmem:[%s2369_s2 + $0x8] sm:$0xff] }
 0x5da   :  { %1272 = vadd.xlane.f32.xlu1 %v1271_v18 }
 0x5db   :  { %v1274_v20 = vsel %vm83_vm1, %v1268_v19, 0.0 }
 0x5dc   :  { %1275 = vadd.xlane.f32.xlu0 %v1274_v20 }
 0x667   :  { %v1273_v21 = vpop.xlane.xlu1 %1272 }
 0x668   :  { %v1278_v22 = vmul.f32 0.03125, %v1273_v21 }
 0x669   :  { %v1276_v23 = vpop.xlane.xlu0 %1275 }
 0x66a   :  { %v1280_v24 = vsub.f32 %v1267_v17, %v1278_v22  ;;  %v1279_v25 = vmul.f32 0.03125, %v1276_v23  ;;  %v1604_v22 = vld [vmem:[%s2381_s14] ss:$0 sm:$0xff] }
 0x66c   :  { %v1281_v26 = vsub.f32 %v1268_v19, %v1279_v25  ;;  %v1282_v27 = vmul.f32 %v1280_v24, %v1280_v24 }
 0x66e   :  { %v1284_v28 = vsel %vm83_vm1, %v1282_v27, 0.0  ;;  %v1283_v29 = vmul.f32 %v1281_v26, %v1281_v26 }
 0x66f   :  { %1285 = vadd.xlane.f32.xlu0 %v1284_v28 }
 0x670   :  { %v1287_v9 = vsel %vm83_vm1, %v1283_v29, 0.0 }
 0x671   :  { %1288 = vadd.xlane.f32.xlu1 %v1287_v9 }
 0x682   :  { %1321 = vperm.xlu1 %1845, %v65_v10  }
 0x685   :  { %1316 = vperm.xlu0 %1844, %v64_v30  }
 0x6fc   :  { %v1286_v33 = vpop.xlane.xlu0 %1285 }
 0x6fd   :  { %v1290_v34 = vmul.f32 0.03125, %v1286_v33 }
 0x6fe   :  { %v1289_v35 = vpop.xlane.xlu1 %1288 }
 0x6ff   :  { %v1292_v36 = vadd.f32 1e-06, %v1290_v34  ;;  %v1291_v37 = vmul.f32 0.03125, %v1289_v35 }
 0x701   :  { %1892 = vrsqrt.f32 %v1292_v36  ;;  %v1293_v38 = vadd.f32 1e-06, %v1291_v37 }
 0x702   :  { %v2314_v51 = vpop.permute.xlu1 %1321 }
 0x703   :  { %1894 = vrsqrt.f32 %v1293_v38 }
 0x704   :  { %v2312_v49 = vpop.permute.xlu0 %1316 }
 0x70b   :  { %v1893_v39 = vpop.eup %1892 }
 0x70c   :  { %v1296_v41 = vmul.f32 %v1893_v39, %v1280_v24 }
 0x70d   :  { %v1895_v42 = vpop.eup %1894 }
 0x70e   :  { %v1304_v44 = vmul.f32 %v1598_v40, %v1296_v41  ;;  %v1297_v45 = vmul.f32 %v1895_v42, %v1281_v26 }
 0x710   :  { %v1312_v46 = vadd.f32 %v1599_v43, %v1304_v44  ;;  %v1305_v47 = vmul.f32 %v1598_v40, %v1297_v45 }
 0x712   :  { %v1313_v52 = vadd.f32 %v1599_v43, %v1305_v47  ;;  %v1324_v53 = vmul.f32 %v2312_v49, %v1312_v46 }
 0x714   :  { %v1325_v54 = vmul.f32 %v2314_v51, %v1313_v52  ;;  %v1610_v52 = vld [vmem:[%s2382_s15] ss:$0 sm:$0xff]  ;;  %s1904_s15 = scalar_lea.vmem %s1553_s26, 256 }
 0x715   :  { %p1905_p0 = scmp.ne.s32.totalorder %s1553_s26, %s1904_s15  ;;  %p1910_p2 = scmp.lt.s32.totalorder %s1904_s15, %s1904_s15 }
 0x716   :  { %v1326_v55 = vpack.c.bf16 %v1325_v54, %v1324_v53 }
 0x717   :  { %p1911_p3 = por %p1910_p2, %p1909_p1 }
 0x718   :  { %1803 = vmatmul.mubr.msk.bf16.vlgmr.msra.gmra.mrb[40].mxu0 %vm83_vm1, %v1326_v55 }
 0x719   :  { %p1912_p4 = pnand %p1911_p3, %p1905_p0 }
 0x7eb   :  { %v1387_v59 = vpop.f32.mrb[40].mxu0 }
 0x7ec   :  { %v1388_v60 = vadd.f32 %v1600_v58, %v1387_v59  ;;  %v1804_v61 = vpop.f32.mrb[41].mxu0 }
 0x7ed   :  { %v1390_v62 = vpop.f32.mrb[42].mxu0 }
 0x7ee   :  { %v1396_v63 = vmul.f32 0.044715, %v1388_v60  ;;  %v1391_v0 = vadd.f32 %v1600_v58, %v1390_v62  ;;  %v1805_v2 = vpop.f32.mrb[43].mxu0  ;;  %v1394_v16 = vmul.f32 0.5, %v1388_v60 }
 0x7f0   :  { %v1398_v3 = vmul.f32 %v1396_v63, %v1388_v60  ;;  %v1397_v4 = vmul.f32 0.044715, %v1391_v0  ;;  %v1395_v17 = vmul.f32 0.5, %v1391_v0 }
 0x7f2   :  { %v1400_v6 = vmul.f32 %v1398_v3, %v1388_v60  ;;  %v1399_v7 = vmul.f32 %v1397_v4, %v1391_v0 }
 0x7f4   :  { %v1402_v8 = vadd.f32 %v1400_v6, %v1388_v60  ;;  %v1401_v11 = vmul.f32 %v1399_v7, %v1391_v0 }
 0x7f6   :  { %v1404_v12 = vmul.f32 0.7978846, %v1402_v8  ;;  %v1403_v1 = vadd.f32 %v1401_v11, %v1391_v0 }
 0x7f8   :  { %1896 = vtanh.f32 %v1404_v12  ;;  %v1405_v13 = vmul.f32 0.7978846, %v1403_v1 }
 0x7fa   :  { %1898 = vtanh.f32 %v1405_v13 }
 0x802   :  { %v1897_v5 = vpop.eup %1896 }
 0x803   :  { %v1408_v14 = vadd.f32 1.0, %v1897_v5 }
 0x804   :  { %v1899_v15 = vpop.eup %1898 }
 0x805   :  { %v1409_v18 = vadd.f32 1.0, %v1899_v15  ;;  %v1410_v19 = vmul.f32 %v1408_v14, %v1394_v16 }
 0x807   :  { %v1411_v20 = vmul.f32 %v1409_v18, %v1395_v17 }
 0x809   :  { %v1412_v21 = vpack.c.bf16 %v1411_v20, %v1410_v19 }
 0x80b   :  { %1815 = vmatmul.mubr.msk.bf16.vlgmr.msra.gmra.mrb[40].mxu1 %vm1452_vm13, %v1412_v21 }
 0x8de   :  { %v1490_v23 = vpop.f32.mrb[40].mxu1 }
 0x8df   :  { %v1491_v24 = vadd.f32 %v1604_v22, %v1490_v23  ;;  %v1816_v25 = vpop.f32.mrb[41].mxu1 }
 0x8e0   :  { %v1493_v26 = vpop.f32.mrb[42].mxu1 }
 0x8e1   :  { %v1494_v27 = vadd.f32 %v1604_v22, %v1493_v26  ;;  %v1817_v28 = vpop.f32.mrb[43].mxu1  ;;  %v1497_v29 = vadd.f32 %v1491_v24, %v1324_v53 }
 0x8e3   :  { %v1501_v9 = vsel %vm83_vm1, %v1497_v29, 0.0  ;;  %v1498_v10 = vadd.f32 %v1494_v27, %v1325_v54  ;;  %v1611_v54 = vld [vmem:[%s2383_s16] ss:$0 sm:$0xff] }
 0x8e4   :  { %1502 = vadd.xlane.f32.xlu1 %v1501_v9 }
 0x8e5   :  { %v1504_v30 = vsel %vm83_vm1, %v1498_v10, 0.0 }
 0x8e6   :  { %1505 = vadd.xlane.f32.xlu0 %v1504_v30 }
 0x971   :  { %v1503_v31 = vpop.xlane.xlu1 %1502 }
 0x972   :  { %v1507_v32 = vmul.f32 0.03125, %v1503_v31 }
 0x973   :  { %v1506_v33 = vpop.xlane.xlu0 %1505 }
 0x974   :  { %v1509_v34 = vsub.f32 %v1497_v29, %v1507_v32  ;;  %v1508_v35 = vmul.f32 0.03125, %v1506_v33 }
 0x976   :  { %v1510_v36 = vsub.f32 %v1498_v10, %v1508_v35  ;;  %v1511_v37 = vmul.f32 %v1509_v34, %v1509_v34 }
 0x978   :  { %v1513_v38 = vsel %vm83_vm1, %v1511_v37, 0.0  ;;  %v1512_v39 = vmul.f32 %v1510_v36, %v1510_v36 }
 0x979   :  { %1514 = vadd.xlane.f32.xlu1 %v1513_v38 }
 0x97a   :  { %v1516_v40 = vsel %vm83_vm1, %v1512_v39, 0.0 }
 0x97d   :  { %1517 = vadd.xlane.f32.xlu1 %v1516_v40 }
 0xa06   :  { %v1515_v41 = vpop.xlane.xlu1 %1514 }
 0xa07   :  { %v1519_v42 = vmul.f32 0.03125, %v1515_v41 }
 0xa09   :  { %v1521_v43 = vadd.f32 1e-06, %v1519_v42 }
 0xa0a   :  { %v1518_v44 = vpop.xlane.xlu1 %1517 }
 0xa0b   :  { %1900 = vrsqrt.f32 %v1521_v43  ;;  %v1520_v45 = vmul.f32 0.03125, %v1518_v44 }
 0xa0d   :  { %v1522_v46 = vadd.f32 1e-06, %v1520_v45 }
 0xa0f   :  { %1902 = vrsqrt.f32 %v1522_v46 }
 0xa15   :  { %v1901_v47 = vpop.eup %1900 }
 0xa16   :  { %v1525_v53 = vmul.f32 %v1901_v47, %v1509_v34 }
 0xa18   :  { %v1533_v55 = vmul.f32 %v1610_v52, %v1525_v53 }
 0xa19   :  { %v1903_v50 = vpop.eup %1902 }
 0xa1a   :  { %v1526_v48 = vmul.f32 %v1903_v50, %v1510_v36  ;;  %v1541_v56 = vadd.f32 %v1611_v54, %v1533_v55 }
 0xa1c   :  { %v1534_v57 = vmul.f32 %v1610_v52, %v1526_v48  ;;  %v1543_v58 = vmul.f32 %v1541_v56, %v2312_v49 }
 0xa1e   :  { %v1542_v59 = vadd.f32 %v1611_v54, %v1534_v57  ;;  %1545 = vst.msk [vmem:[#allocation2] sm:$0xff] %vm83_vm1, %v1543_v58 }
 0xa20   :  { %v1544_v60 = vmul.f32 %v1542_v59, %v2314_v51 }
 0xa22   :  { %1546 = vst.msk [vmem:[#allocation2 + $0x8] sm:$0xff] %vm83_vm1, %v1544_v60 }
 0xa23   :  { %1915 = shalt.err (!%p1912_p4)
}
 0xa24   :  { %s1916_s28 = scalar_lea.hbm %s2384_s17, 256 }
 0xa25   :  { %p1917_p5 = scmp.ne.s32.totalorder %s2384_s17, %s1916_s28  ;;  %p1920_p6 = scmp.lt.u32.totalorder %s1916_s28, %s2384_s17 }
 0xa27   :  { %p1922_p7 = pnand %p1920_p6, %p1917_p5 }
 0xa29   :  { %1925 = shalt.err (!%p1922_p7)
}
 0xa2a   :  { %s1938_s30 = smov 128  }
 0xa2b   :  { %1558 = dma.vmem_to_hbm [thread:$0]  %s1553_s26, 256, %s2384_s17, [#allocation3], %s1938_s30, %s1938_s30, %s1934_s3  }
 0xa2c   :  { %1926 = dma.done.wait [#allocation3], 256  }
 0xa2d   :  { %1927 = vsyncadd [#allocation3], 4294967040 }
 0xa2e   :  { %1562 = vsyncpa [#allocation3], 1 }

</bundles_post_ra>
